<compile_context>
chip_gen: v6e
topology: v6e:2x2x1
jax: 0.10.0
libtpu: 0.0.40
codegen_flags: <defaults>
</compile_context>

<pallas_src>
import jax
import jax.numpy as jnp
from jax import lax
from jax.experimental import pallas as pl
from jax.experimental.pallas import tpu as pltpu

D_MODEL = 32
FF_HIDDEN = 4 * D_MODEL            # FusedMLP default expansion
N_HEADS = 4
HEAD_DIM = 8                       # n_heads * head_dim == d_model
INNER = N_HEADS * HEAD_DIM
CONV_K = 5                         # depthwise kernel size (odd, 'same' padding)
LN_EPS = 1e-5
QKV_PAD = ((3 * INNER + 127) // 128) * 128   # lane-dense qkv width (96 -> 128)

# ----- packed small-parameter slab: row indices into the (rows, D) vec32 array -----
_V_FF1_G, _V_FF1_B, _V_FF1_B2 = 0, 1, 2
_V_ATT_G, _V_ATT_B = 3, 4
_V_CNV_G, _V_CNV_B = 5, 6
_V_PW1V_B, _V_PW1G_B = 7, 8
_V_DW_B = 9
_V_BN_S, _V_BN_B = 10, 11
_V_PW2_B = 12
_V_FF2_G, _V_FF2_B, _V_FF2_B2 = 13, 14, 15
_V_OUT_G, _V_OUT_B = 16, 17
_V_DW_W0 = 18                       # rows 18 .. 18+CONV_K-1: depthwise taps


# ----------------------------------------------------------------------------
# shared math helpers (used inside the Pallas kernel AND the pure-JAX reference)
# ----------------------------------------------------------------------------
def _layernorm(x, g, b):
    mu = jnp.mean(x, axis=-1, keepdims=True)
    var = jnp.mean(jnp.square(x - mu), axis=-1, keepdims=True)
    return (x - mu) * lax.rsqrt(var + LN_EPS) * g + b


def _gelu_tanh(x):
    # tanh-approximate GELU (FusedMLP default activation); kept for spec fidelity.
    c = 0.7978845608028654  # sqrt(2/pi)
    return 0.5 * x * (1.0 + jnp.tanh(c * (x + 0.044715 * x * x * x)))


def _mm(a, w):
    # MXU matmul: bf16 operands, f32 accumulation.
    return jnp.dot(a.astype(jnp.bfloat16), w.astype(jnp.bfloat16),
                   preferred_element_type=jnp.float32)


# ----------------------------------------------------------------------------
# fused Conformer-layer kernel: one grid step == one utterance (T rows)
# ----------------------------------------------------------------------------
def _conformer_layer_kernel(
        len_ref,                                   # (B,) int32, SMEM (scalar prefetch)
        x_ref,                                     # (T, D) f32 block of this utterance
        v32_ref, v128_ref,                         # packed small params
        f1w1_ref, f1w2_ref,                        # FF1 weights (bf16)
        wqkv_ref, wo_ref,                          # attention weights (bf16)
        cw1v_ref, cw1g_ref, cw2_ref,               # conv pointwise weights (bf16)
        f2w1_ref, f2w2_ref,                        # FF2 weights (bf16)
        o_ref):
    T, D = x_ref.shape
    length = len_ref[pl.program_id(0)]             # valid frames in this utterance
    v32 = v32_ref[...]                             # (rows, D) packed vectors, loaded once

    def vec(i):                                    # (1, D) row of the packed slab
        return v32[i:i + 1, :]

    def ffn(x, gi, bi, w1_ref, b1_row, w2_ref, b2i):   # Scale(0.5, PreNorm(FusedMLP))
        xn = _layernorm(x, vec(gi), vec(bi))
        h = _gelu_tanh(_mm(xn, w1_ref[...]) + v128_ref[b1_row:b1_row + 1, :])
        return x + 0.5 * (_mm(h, w2_ref[...]) + vec(b2i))

    x = x_ref[...]                                 # (T, D) f32

    # ---- 0.5 * FF1(LN(x)) + x -------------------------------------------------
    x = ffn(x, _V_FF1_G, _V_FF1_B, f1w1_ref, 0, f1w2_ref, _V_FF1_B2)

    # ---- Attn(LN(x)) + x  (sandwich_norm=False -> identity out-norm) -----------
    xn = _layernorm(x, vec(_V_ATT_G), vec(_V_ATT_B))
    qkv = _mm(xn, wqkv_ref[...])                   # (T, 128) lane-dense; cols >=96 are zero pad
    kidx = lax.broadcasted_iota(jnp.int32, (1, T), 1)
    key_bias = jnp.where(kidx < length, 0.0, -1e9)          # additive key-padding bias (1, T)
    scale = 1.0 / (HEAD_DIM ** 0.5)
    ctxs = []
    for hd in range(N_HEADS):                      # static unroll; scores are (T, T) per head
        lo = hd * HEAD_DIM
        qh = qkv[:, lo:lo + HEAD_DIM].astype(jnp.bfloat16)
        kh = qkv[:, INNER + lo:INNER + lo + HEAD_DIM].astype(jnp.bfloat16)
        vh = qkv[:, 2 * INNER + lo:2 * INNER + lo + HEAD_DIM].astype(jnp.bfloat16)
        s = lax.dot_general(qh, kh, (((1,), (1,)), ((), ())),
                            preferred_element_type=jnp.float32) * scale + key_bias
        s = s - jnp.max(s, axis=-1, keepdims=True)
        p = jnp.exp(s)
        p = p / jnp.sum(p, axis=-1, keepdims=True)           # exact softmax
        ctxs.append(_mm(p, vh))                              # (T, HEAD_DIM) f32
    ctx = jnp.concatenate(ctxs, axis=-1)                     # (T, INNER)
    x = x + _mm(ctx, wo_ref[...])                            # single K=32 output projection

    # ---- ConformerConv(LN(x), pad_mask) + x ------------------------------------
    ridx = lax.broadcasted_iota(jnp.int32, (T, 1), 0)        # time index, hoisted once
    keep_row = (ridx < length).astype(jnp.float32)           # (T, 1): masked_fill(pad, 0)
    xn = _layernorm(x, vec(_V_CNV_G), vec(_V_CNV_B)) * keep_row
    h = (_mm(xn, cw1v_ref[...]) + vec(_V_PW1V_B)) * \
        jax.nn.sigmoid(_mm(xn, cw1g_ref[...]) + vec(_V_PW1G_B))   # GLU, no lane-32 slicing
    # depthwise conv over time: sublane rotations + utterance-boundary zero masks
    P = (CONV_K - 1) // 2
    y = h * vec(_V_DW_W0 + P)                                # center tap needs no mask
    for k in range(CONV_K):
        sh = P - k                                           # tap k reads h[t - sh]
        if sh == 0:
            continue
        # positive rotation amount (sh % T): for sh < 0 this is T + sh by construction.
        tap = pltpu.roll(h, shift=sh % T, axis=0)
        if sh > 0:
            m = (ridx >= sh).astype(jnp.float32)             # source index t-sh < 0 -> zero
        else:
            m = (ridx < T + sh).astype(jnp.float32)          # source index t-sh >= T -> zero
        y = y + (tap * m) * vec(_V_DW_W0 + k)
    y = y + vec(_V_DW_B)
    y = y * vec(_V_BN_S) + vec(_V_BN_B)                      # batch-renorm (eval) = affine
    y = y * jax.nn.sigmoid(y)                                # SiLU / Swish
    x = x + (_mm(y, cw2_ref[...]) + vec(_V_PW2_B))           # pointwise conv 2

    # ---- 0.5 * FF2(LN(x)) + x, then norm_out ------------------------------------
    x = ffn(x, _V_FF2_G, _V_FF2_B, f2w1_ref, 1, f2w2_ref, _V_FF2_B2)
    o_ref[...] = _layernorm(x, vec(_V_OUT_G), vec(_V_OUT_B))


# ----------------------------------------------------------------------------
# host-side parameter packing (natural shapes -> DMA-friendly slabs)
# ----------------------------------------------------------------------------
def _pack_params(params):
    f1g, f1b, f1w1, f1b1, f1w2, f1b2 = params["ff1"]
    ag, ab, wqkv, wo = params["attn"]
    cg, cb, cw1, cb1, cwd, cbd, cbs, cbb, cw2, cb2 = params["conv"]
    f2g, f2b, f2w1, f2b1, f2w2, f2b2 = params["ff2"]
    og, ob = params["norm_out"]
    D = D_MODEL
    bf16 = jnp.bfloat16

    rows = [f1g, f1b, f1b2, ag, ab, cg, cb,
            cb1[:, :D], cb1[:, D:], cbd, cbs, cbb, cb2,
            f2g, f2b, f2b2, og, ob] + [cwd[k:k + 1, :] for k in range(CONV_K)]
    vec32 = jnp.concatenate([r.astype(jnp.float32) for r in rows], axis=0)
    pad = (-vec32.shape[0]) % 8
    if pad:
        vec32 = jnp.concatenate([vec32, jnp.zeros((pad, D), jnp.float32)], axis=0)
    vec128 = jnp.concatenate([f1b1.astype(jnp.float32),
                              f2b1.astype(jnp.float32)], axis=0)          # (2, FF_HIDDEN)

    wqkv_p = jnp.concatenate(
        [wqkv.astype(bf16), jnp.zeros((D, QKV_PAD - 3 * INNER), bf16)], axis=1)
    mats = [f1w1.astype(bf16), f1w2.astype(bf16),
            wqkv_p, wo.astype(bf16),
            cw1[:, :D].astype(bf16), cw1[:, D:].astype(bf16), cw2.astype(bf16),
            f2w1.astype(bf16), f2w2.astype(bf16)]
    return vec32, vec128, mats


# ----------------------------------------------------------------------------
# pallas_call wrapper
# ----------------------------------------------------------------------------
def conformer_layer(x, lengths, params):
    """x: (B, T, D) f32; lengths: (B,) int32 valid-frame counts per utterance."""
    B, T, D = x.shape
    assert T % 8 == 0, "TODO(synk): pad the time axis to a multiple of 8 for general T"
    x2d = x.reshape(B * T, D)
    vec32, vec128, mats = _pack_params(params)

    const_spec = lambda shp: pl.BlockSpec(shp, lambda b, lens: (0,) * len(shp))
    grid_spec = pltpu.PrefetchScalarGridSpec(
        num_scalar_prefetch=1,                      # lengths -> SMEM, readable everywhere
        grid=(B,),                                  # one grid step per utterance
        in_specs=[pl.BlockSpec((T, D), lambda b, lens: (b, 0)),     # activation rows
                  const_spec(vec32.shape), const_spec(vec128.shape),
                  *[const_spec(m.shape) for m in mats]],            # weights stay resident
        out_specs=pl.BlockSpec((T, D), lambda b, lens: (b, 0)),
    )
    out = pl.pallas_call(
        _conformer_layer_kernel,
        out_shape=jax.ShapeDtypeStruct((B * T, D), jnp.float32),
        grid_spec=grid_spec,
        compiler_params=pltpu.CompilerParams(
            dimension_semantics=("parallel",),      # megacore split across utterances
            vmem_limit_bytes=32 * 1024 * 1024),     # explicit, safe on v5e/v6e/v7x
    )(lengths.astype(jnp.int32), x2d, vec32, vec128, *mats)
    return out.reshape(B, T, D)


# ----------------------------------------------------------------------------
# deterministic parameter init (synthetic, matches module shapes)
# ----------------------------------------------------------------------------
def init_params(key):
    bf16 = jnp.bfloat16

    def u(k, shape, fan_in, dtype=jnp.float32):
        lim = 1.0 / (fan_in ** 0.5)
        return jax.random.uniform(k, shape, jnp.float32, -lim, lim).astype(dtype)

    def ln_p(k):
        kg, kb = jax.random.split(k)
        g = 1.0 + 0.05 * jax.random.normal(kg, (1, D_MODEL), jnp.float32)
        b = 0.05 * jax.random.normal(kb, (1, D_MODEL), jnp.float32)
        return g, b

    def ff_p(k):
        k1, k2, k3, k4, kn = jax.random.split(k, 5)
        g, b = ln_p(kn)
        return (g, b,
                u(k1, (D_MODEL, FF_HIDDEN), D_MODEL, bf16),    # W1 (bf16 MXU operand)
                u(k2, (1, FF_HIDDEN), D_MODEL),                # b1
                u(k3, (FF_HIDDEN, D_MODEL), FF_HIDDEN, bf16),  # W2
                u(k4, (1, D_MODEL), FF_HIDDEN))                # b2

    k_ff1, k_ff2, k_attn, k_conv, k_out = jax.random.split(key, 5)

    ka1, ka2, kan = jax.random.split(k_attn, 3)
    attn = (*ln_p(kan),
            u(ka1, (D_MODEL, 3 * INNER), D_MODEL, bf16),       # Wqkv (bias=False)
            u(ka2, (INNER, D_MODEL), INNER, bf16))             # Wout (bias=False)

    kc = jax.random.split(k_conv, 9)
    conv = (*ln_p(kc[0]),
            u(kc[1], (D_MODEL, 2 * D_MODEL), D_MODEL, bf16),   # pointwise_conv1 W
            u(kc[2], (1, 2 * D_MODEL), D_MODEL),               # pointwise_conv1 b
            u(kc[3], (CONV_K, D_MODEL), CONV_K),               # depthwise W (per-channel)
            u(kc[4], (1, D_MODEL), CONV_K),                    # depthwise b
            1.0 + 0.05 * jax.random.normal(kc[5], (1, D_MODEL), jnp.float32),  # BN scale
            0.05 * jax.random.normal(kc[6], (1, D_MODEL), jnp.float32),        # BN shift
            u(kc[7], (D_MODEL, D_MODEL), D_MODEL, bf16),       # pointwise_conv2 W
            u(kc[8], (1, D_MODEL), D_MODEL))                   # pointwise_conv2 b

    return {"ff1": ff_p(k_ff1), "ff2": ff_p(k_ff2), "attn": attn,
            "conv": conv, "norm_out": ln_p(k_out)}


# ----------------------------------------------------------------------------
# pure-JAX reference (same math / same bf16 matmul precision, different structure)
# ----------------------------------------------------------------------------
def reference(x, lengths, params):
    B, T, D = x.shape
    pos = jnp.arange(T)
    keep_bt = (pos[None, :] < lengths[:, None]).astype(jnp.float32)   # (B, T)
    keep = keep_bt[..., None]                                         # (B, T, 1)
    attn_bias = (keep_bt - 1.0)[:, None, None, :] * 1e9               # key-only mask

    def ffn(x, p):
        g, b, w1, b1, w2, b2 = p
        y = _mm(_gelu_tanh(_mm(_layernorm(x, g, b), w1) + b1), w2) + b2
        return x + 0.5 * y

    x = ffn(x, params["ff1"])

    g, b, wqkv, wo = params["attn"]
    xn = _layernorm(x, g, b)
    qkv = _mm(xn, wqkv)
    q, k, v = qkv[..., :INNER], qkv[..., INNER:2 * INNER], qkv[..., 2 * INNER:]
    q = q.reshape(B, T, N_HEADS, HEAD_DIM).transpose(0, 2, 1, 3)
    k = k.reshape(B, T, N_HEADS, HEAD_DIM).transpose(0, 2, 1, 3)
    v = v.reshape(B, T, N_HEADS, HEAD_DIM).transpose(0, 2, 1, 3)
    s = jnp.einsum("bhqd,bhkd->bhqk", q.astype(jnp.bfloat16), k.astype(jnp.bfloat16),
                   preferred_element_type=jnp.float32) / (HEAD_DIM ** 0.5) + attn_bias
    p = jax.nn.softmax(s, axis=-1)
    ctx = jnp.einsum("bhqk,bhkd->bhqd", p.astype(jnp.bfloat16), v.astype(jnp.bfloat16),
                     preferred_element_type=jnp.float32)
    ctx = ctx.transpose(0, 2, 1, 3).reshape(B, T, INNER)
    x = x + _mm(ctx, wo)

    g, b, w1, b1, wdw, bdw, bns, bnb, w2, b2 = params["conv"]
    xn = _layernorm(x, g, b) * keep
    h = _mm(xn, w1) + b1
    h = h[..., :D] * jax.nn.sigmoid(h[..., D:])
    P = (CONV_K - 1) // 2
    hp = jnp.pad(h, ((0, 0), (P, P), (0, 0)))
    y = jnp.zeros_like(h)
    for kk in range(CONV_K):
        y = y + hp[:, kk:kk + T, :] * wdw[kk]
    y = y + bdw
    y = y * bns + bnb
    y = y * jax.nn.sigmoid(y)
    x = x + (_mm(y, w2) + b2)

    x = ffn(x, params["ff2"])
    return _layernorm(x, *params["norm_out"])


# ----------------------------------------------------------------------------
if __name__ == "__main__":
    key = jax.random.PRNGKey(0)
    k_x, k_p = jax.random.split(key)

    B, T = 2, 8
    x = jax.random.normal(k_x, (B, T, D_MODEL), jnp.float32)
    lengths = jnp.array([T, T - 2], jnp.int32)      # second utterance has 2 padded frames
    params = init_params(k_p)

    out = conformer_layer(x, lengths, params)
    out = jax.block_until_ready(out)

    ref = reference(x, lengths, params)
    assert out.shape == (B, T, D_MODEL)
    assert bool(jnp.all(jnp.isfinite(out)))
    err = float(jnp.max(jnp.abs(out - ref)))
    # bf16 MXU operands leave ~1e-3 slack; 5e-2 still catches head-ordering /
    # conv-tap / masking bugs (those give O(1) errors).
    assert err < 5e-2, f"max abs err vs reference: {err}"
    print("KERNEL_OK")
</pallas_src>

<mosaic_0001>
module attributes {stable_mosaic.version = 11 : i64} {
  func.func @_conformer_layer_kernel(%arg0: i32, %arg1: memref<2xi32, #tpu.memory_space<smem>>, %arg2: memref<8x32xf32, #tpu.memory_space<vmem>>, %arg3: memref<24x32xf32, #tpu.memory_space<vmem>>, %arg4: memref<2x128xf32, #tpu.memory_space<vmem>>, %arg5: memref<32x128xbf16, #tpu.memory_space<vmem>>, %arg6: memref<128x32xbf16, #tpu.memory_space<vmem>>, %arg7: memref<32x128xbf16, #tpu.memory_space<vmem>>, %arg8: memref<32x32xbf16, #tpu.memory_space<vmem>>, %arg9: memref<32x32xbf16, #tpu.memory_space<vmem>>, %arg10: memref<32x32xbf16, #tpu.memory_space<vmem>>, %arg11: memref<32x32xbf16, #tpu.memory_space<vmem>>, %arg12: memref<32x128xbf16, #tpu.memory_space<vmem>>, %arg13: memref<128x32xbf16, #tpu.memory_space<vmem>>, %arg14: memref<8x32xf32, #tpu.memory_space<vmem>>) attributes {dimension_semantics = [#tpu.dimension_semantics<parallel>], iteration_bounds = array<i64: 2>, scalar_prefetch = 1 : i64, scratch_operands = 0 : i64, tpu.core_type = #tpu.core_type<tc>, window_params = [{transform_indices = @transform_0, window_bounds = array<i64: 8, 32>}, {pipeline_mode = #tpu.pipeline_mode<synchronous>, transform_indices = @transform_1, window_bounds = array<i64: 24, 32>}, {pipeline_mode = #tpu.pipeline_mode<synchronous>, transform_indices = @transform_2, window_bounds = array<i64: 2, 128>}, {pipeline_mode = #tpu.pipeline_mode<synchronous>, transform_indices = @transform_3, window_bounds = array<i64: 32, 128>}, {pipeline_mode = #tpu.pipeline_mode<synchronous>, transform_indices = @transform_4, window_bounds = array<i64: 128, 32>}, {pipeline_mode = #tpu.pipeline_mode<synchronous>, transform_indices = @transform_5, window_bounds = array<i64: 32, 128>}, {pipeline_mode = #tpu.pipeline_mode<synchronous>, transform_indices = @transform_6, window_bounds = array<i64: 32, 32>}, {pipeline_mode = #tpu.pipeline_mode<synchronous>, transform_indices = @transform_7, window_bounds = array<i64: 32, 32>}, {pipeline_mode = #tpu.pipeline_mode<synchronous>, transform_indices = @transform_8, window_bounds = array<i64: 32, 32>}, {pipeline_mode = #tpu.pipeline_mode<synchronous>, transform_indices = @transform_9, window_bounds = array<i64: 32, 32>}, {pipeline_mode = #tpu.pipeline_mode<synchronous>, transform_indices = @transform_10, window_bounds = array<i64: 32, 128>}, {pipeline_mode = #tpu.pipeline_mode<synchronous>, transform_indices = @transform_11, window_bounds = array<i64: 128, 32>}, {transform_indices = @transform_12, window_bounds = array<i64: 8, 32>}]} {
    %0 = arith.index_cast %arg0 : i32 to index
    %1 = memref.load %arg1[%0] : memref<2xi32, #tpu.memory_space<smem>>
    %c0 = arith.constant 0 : index
    %c0_0 = arith.constant 0 : index
    %2 = vector.load %arg3[%c0, %c0_0] : memref<24x32xf32, #tpu.memory_space<vmem>>, vector<24x32xf32>
    %c0_1 = arith.constant 0 : index
    %c0_2 = arith.constant 0 : index
    %3 = vector.load %arg2[%c0_1, %c0_2] : memref<8x32xf32, #tpu.memory_space<vmem>>, vector<8x32xf32>
    %4 = vector.extract_strided_slice %2 {offsets = [0, 0], sizes = [1, 32], strides = [1, 1]} : vector<24x32xf32> to vector<1x32xf32>
    %5 = vector.extract_strided_slice %2 {offsets = [1, 0], sizes = [1, 32], strides = [1, 1]} : vector<24x32xf32> to vector<1x32xf32>
    %cst = arith.constant dense<0.000000e+00> : vector<8xf32>
    %6 = vector.multi_reduction <add>, %3, %cst [1] : vector<8x32xf32> to vector<8xf32>
    %7 = vector.shape_cast %6 : vector<8xf32> to vector<8x1xf32>
    %cst_3 = arith.constant 3.200000e+01 : f32
    %8 = vector.broadcast %cst_3 : f32 to vector<8x1xf32>
    %9 = arith.divf %7, %8 : vector<8x1xf32>
    %10 = vector.broadcast %9 : vector<8x1xf32> to vector<8x32xf32>
    %11 = arith.subf %3, %10 : vector<8x32xf32>
    %12 = arith.mulf %11, %11 : vector<8x32xf32>
    %cst_4 = arith.constant dense<0.000000e+00> : vector<8xf32>
    %13 = vector.multi_reduction <add>, %12, %cst_4 [1] : vector<8x32xf32> to vector<8xf32>
    %14 = vector.shape_cast %13 : vector<8xf32> to vector<8x1xf32>
    %cst_5 = arith.constant 3.200000e+01 : f32
    %15 = vector.broadcast %cst_5 : f32 to vector<8x1xf32>
    %16 = arith.divf %14, %15 : vector<8x1xf32>
    %17 = vector.broadcast %9 : vector<8x1xf32> to vector<8x32xf32>
    %18 = arith.subf %3, %17 : vector<8x32xf32>
    %cst_6 = arith.constant 9.99999974E-6 : f32
    %19 = vector.broadcast %cst_6 : f32 to vector<8x1xf32>
    %20 = arith.addf %16, %19 : vector<8x1xf32>
    %21 = math.rsqrt %20 : vector<8x1xf32>
    %22 = vector.broadcast %21 : vector<8x1xf32> to vector<8x32xf32>
    %23 = arith.mulf %18, %22 : vector<8x32xf32>
    %24 = vector.broadcast %4 : vector<1x32xf32> to vector<8x32xf32>
    %25 = arith.mulf %23, %24 : vector<8x32xf32>
    %26 = vector.broadcast %5 : vector<1x32xf32> to vector<8x32xf32>
    %27 = arith.addf %25, %26 : vector<8x32xf32>
    %c0_7 = arith.constant 0 : index
    %c0_8 = arith.constant 0 : index
    %28 = vector.load %arg5[%c0_7, %c0_8] : memref<32x128xbf16, #tpu.memory_space<vmem>>, vector<32x128xbf16>
    %29 = arith.truncf %27 : vector<8x32xf32> to vector<8x32xbf16>
    %cst_9 = arith.constant dense<0.000000e+00> : vector<8x128xf32>
    %30 = tpu.matmul %29, %28, %cst_9 {dimension_numbers = #tpu.dot_dimension_numbers<[1], [0], [0], [1], [0, 0, 1, 1], [], []>} : vector<8x32xbf16>, vector<32x128xbf16>, vector<8x128xf32> -> vector<8x128xf32>
    %c0_10 = arith.constant 0 : index
    %c0_11 = arith.constant 0 : index
    %31 = vector.load %arg4[%c0_10, %c0_11] : memref<2x128xf32, #tpu.memory_space<vmem>>, vector<1x128xf32>
    %32 = vector.broadcast %31 : vector<1x128xf32> to vector<8x128xf32>
    %33 = arith.addf %30, %32 : vector<8x128xf32>
    %cst_12 = arith.constant 5.000000e-01 : f32
    %34 = vector.broadcast %cst_12 : f32 to vector<8x128xf32>
    %35 = arith.mulf %34, %33 : vector<8x128xf32>
    %cst_13 = arith.constant 4.471500e-02 : f32
    %36 = vector.broadcast %cst_13 : f32 to vector<8x128xf32>
    %37 = arith.mulf %36, %33 : vector<8x128xf32>
    %38 = arith.mulf %37, %33 : vector<8x128xf32>
    %39 = arith.mulf %38, %33 : vector<8x128xf32>
    %40 = arith.addf %33, %39 : vector<8x128xf32>
    %cst_14 = arith.constant 0.797884583 : f32
    %41 = vector.broadcast %cst_14 : f32 to vector<8x128xf32>
    %42 = arith.mulf %41, %40 : vector<8x128xf32>
    %43 = math.tanh %42 : vector<8x128xf32>
    %cst_15 = arith.constant 1.000000e+00 : f32
    %44 = vector.broadcast %cst_15 : f32 to vector<8x128xf32>
    %45 = arith.addf %44, %43 : vector<8x128xf32>
    %46 = arith.mulf %35, %45 : vector<8x128xf32>
    %c0_16 = arith.constant 0 : index
    %c0_17 = arith.constant 0 : index
    %47 = vector.load %arg6[%c0_16, %c0_17] : memref<128x32xbf16, #tpu.memory_space<vmem>>, vector<128x32xbf16>
    %48 = arith.truncf %46 : vector<8x128xf32> to vector<8x128xbf16>
    %cst_18 = arith.constant dense<0.000000e+00> : vector<8x32xf32>
    %49 = tpu.matmul %48, %47, %cst_18 {dimension_numbers = #tpu.dot_dimension_numbers<[1], [0], [0], [1], [0, 0, 1, 1], [], []>} : vector<8x128xbf16>, vector<128x32xbf16>, vector<8x32xf32> -> vector<8x32xf32>
    %50 = vector.extract_strided_slice %2 {offsets = [2, 0], sizes = [1, 32], strides = [1, 1]} : vector<24x32xf32> to vector<1x32xf32>
    %51 = vector.broadcast %50 : vector<1x32xf32> to vector<8x32xf32>
    %52 = arith.addf %49, %51 : vector<8x32xf32>
    %cst_19 = arith.constant 5.000000e-01 : f32
    %53 = vector.broadcast %cst_19 : f32 to vector<8x32xf32>
    %54 = arith.mulf %53, %52 : vector<8x32xf32>
    %55 = arith.addf %3, %54 : vector<8x32xf32>
    %56 = vector.extract_strided_slice %2 {offsets = [3, 0], sizes = [1, 32], strides = [1, 1]} : vector<24x32xf32> to vector<1x32xf32>
    %57 = vector.extract_strided_slice %2 {offsets = [4, 0], sizes = [1, 32], strides = [1, 1]} : vector<24x32xf32> to vector<1x32xf32>
    %cst_20 = arith.constant dense<0.000000e+00> : vector<8xf32>
    %58 = vector.multi_reduction <add>, %55, %cst_20 [1] : vector<8x32xf32> to vector<8xf32>
    %59 = vector.shape_cast %58 : vector<8xf32> to vector<8x1xf32>
    %cst_21 = arith.constant 3.200000e+01 : f32
    %60 = vector.broadcast %cst_21 : f32 to vector<8x1xf32>
    %61 = arith.divf %59, %60 : vector<8x1xf32>
    %62 = vector.broadcast %61 : vector<8x1xf32> to vector<8x32xf32>
    %63 = arith.subf %55, %62 : vector<8x32xf32>
    %64 = arith.mulf %63, %63 : vector<8x32xf32>
    %cst_22 = arith.constant dense<0.000000e+00> : vector<8xf32>
    %65 = vector.multi_reduction <add>, %64, %cst_22 [1] : vector<8x32xf32> to vector<8xf32>
    %66 = vector.shape_cast %65 : vector<8xf32> to vector<8x1xf32>
    %cst_23 = arith.constant 3.200000e+01 : f32
    %67 = vector.broadcast %cst_23 : f32 to vector<8x1xf32>
    %68 = arith.divf %66, %67 : vector<8x1xf32>
    %69 = vector.broadcast %61 : vector<8x1xf32> to vector<8x32xf32>
    %70 = arith.subf %55, %69 : vector<8x32xf32>
    %cst_24 = arith.constant 9.99999974E-6 : f32
    %71 = vector.broadcast %cst_24 : f32 to vector<8x1xf32>
    %72 = arith.addf %68, %71 : vector<8x1xf32>
    %73 = math.rsqrt %72 : vector<8x1xf32>
    %74 = vector.broadcast %73 : vector<8x1xf32> to vector<8x32xf32>
    %75 = arith.mulf %70, %74 : vector<8x32xf32>
    %76 = vector.broadcast %56 : vector<1x32xf32> to vector<8x32xf32>
    %77 = arith.mulf %75, %76 : vector<8x32xf32>
    %78 = vector.broadcast %57 : vector<1x32xf32> to vector<8x32xf32>
    %79 = arith.addf %77, %78 : vector<8x32xf32>
    %c0_25 = arith.constant 0 : index
    %c0_26 = arith.constant 0 : index
    %80 = vector.load %arg7[%c0_25, %c0_26] : memref<32x128xbf16, #tpu.memory_space<vmem>>, vector<32x128xbf16>
    %81 = arith.truncf %79 : vector<8x32xf32> to vector<8x32xbf16>
    %cst_27 = arith.constant dense<0.000000e+00> : vector<8x128xf32>
    %82 = tpu.matmul %81, %80, %cst_27 {dimension_numbers = #tpu.dot_dimension_numbers<[1], [0], [0], [1], [0, 0, 1, 1], [], []>} : vector<8x32xbf16>, vector<32x128xbf16>, vector<8x128xf32> -> vector<8x128xf32>
    %83 = tpu.iota {dimensions = array<i32: 1>} : vector<1x8xi32>
    %84 = vector.broadcast %1 : i32 to vector<1x8xi32>
    %85 = arith.cmpi slt, %83, %84 : vector<1x8xi32>
    %cst_28 = arith.constant 0.000000e+00 : f32
    %cst_29 = arith.constant -1.000000e+09 : f32
    %86 = vector.broadcast %cst_28 : f32 to vector<1x8xf32>
    %87 = vector.broadcast %cst_29 : f32 to vector<1x8xf32>
    %88 = arith.select %85, %86, %87 : vector<1x8xi1>, vector<1x8xf32>
    %89 = vector.extract_strided_slice %82 {offsets = [0, 0], sizes = [8, 8], strides = [1, 1]} : vector<8x128xf32> to vector<8x8xf32>
    %90 = arith.truncf %89 : vector<8x8xf32> to vector<8x8xbf16>
    %91 = vector.extract_strided_slice %82 {offsets = [0, 32], sizes = [8, 8], strides = [1, 1]} : vector<8x128xf32> to vector<8x8xf32>
    %92 = arith.truncf %91 : vector<8x8xf32> to vector<8x8xbf16>
    %93 = vector.extract_strided_slice %82 {offsets = [0, 64], sizes = [8, 8], strides = [1, 1]} : vector<8x128xf32> to vector<8x8xf32>
    %94 = arith.truncf %93 : vector<8x8xf32> to vector<8x8xbf16>
    %cst_30 = arith.constant dense<0.000000e+00> : vector<8x8xf32>
    %95 = tpu.matmul %90, %92, %cst_30 {dimension_numbers = #tpu.dot_dimension_numbers<[1], [1], [0], [0], [0, 0, 1, 0], [], []>} : vector<8x8xbf16>, vector<8x8xbf16>, vector<8x8xf32> -> vector<8x8xf32>
    %cst_31 = arith.constant 0.353553385 : f32
    %96 = vector.broadcast %cst_31 : f32 to vector<8x8xf32>
    %97 = arith.mulf %95, %96 : vector<8x8xf32>
    %98 = vector.broadcast %88 : vector<1x8xf32> to vector<8x8xf32>
    %99 = arith.addf %97, %98 : vector<8x8xf32>
    %cst_32 = arith.constant dense<0xFF800000> : vector<8xf32>
    %100 = vector.multi_reduction <maximumf>, %99, %cst_32 [1] : vector<8x8xf32> to vector<8xf32>
    %101 = vector.shape_cast %100 : vector<8xf32> to vector<8x1xf32>
    %102 = vector.broadcast %101 : vector<8x1xf32> to vector<8x8xf32>
    %103 = arith.subf %99, %102 : vector<8x8xf32>
    %104 = math.exp %103 : vector<8x8xf32>
    %cst_33 = arith.constant dense<0.000000e+00> : vector<8xf32>
    %105 = vector.multi_reduction <add>, %104, %cst_33 [1] : vector<8x8xf32> to vector<8xf32>
    %106 = vector.shape_cast %105 : vector<8xf32> to vector<8x1xf32>
    %107 = vector.broadcast %106 : vector<8x1xf32> to vector<8x8xf32>
    %108 = arith.divf %104, %107 : vector<8x8xf32>
    %109 = arith.truncf %108 : vector<8x8xf32> to vector<8x8xbf16>
    %cst_34 = arith.constant dense<0.000000e+00> : vector<8x8xf32>
    %110 = tpu.matmul %109, %94, %cst_34 {dimension_numbers = #tpu.dot_dimension_numbers<[1], [0], [0], [1], [0, 0, 1, 1], [], []>} : vector<8x8xbf16>, vector<8x8xbf16>, vector<8x8xf32> -> vector<8x8xf32>
    %111 = vector.extract_strided_slice %82 {offsets = [0, 8], sizes = [8, 8], strides = [1, 1]} : vector<8x128xf32> to vector<8x8xf32>
    %112 = arith.truncf %111 : vector<8x8xf32> to vector<8x8xbf16>
    %113 = vector.extract_strided_slice %82 {offsets = [0, 40], sizes = [8, 8], strides = [1, 1]} : vector<8x128xf32> to vector<8x8xf32>
    %114 = arith.truncf %113 : vector<8x8xf32> to vector<8x8xbf16>
    %115 = vector.extract_strided_slice %82 {offsets = [0, 72], sizes = [8, 8], strides = [1, 1]} : vector<8x128xf32> to vector<8x8xf32>
    %116 = arith.truncf %115 : vector<8x8xf32> to vector<8x8xbf16>
    %cst_35 = arith.constant dense<0.000000e+00> : vector<8x8xf32>
    %117 = tpu.matmul %112, %114, %cst_35 {dimension_numbers = #tpu.dot_dimension_numbers<[1], [1], [0], [0], [0, 0, 1, 0], [], []>} : vector<8x8xbf16>, vector<8x8xbf16>, vector<8x8xf32> -> vector<8x8xf32>
    %cst_36 = arith.constant 0.353553385 : f32
    %118 = vector.broadcast %cst_36 : f32 to vector<8x8xf32>
    %119 = arith.mulf %117, %118 : vector<8x8xf32>
    %120 = vector.broadcast %88 : vector<1x8xf32> to vector<8x8xf32>
    %121 = arith.addf %119, %120 : vector<8x8xf32>
    %cst_37 = arith.constant dense<0xFF800000> : vector<8xf32>
    %122 = vector.multi_reduction <maximumf>, %121, %cst_37 [1] : vector<8x8xf32> to vector<8xf32>
    %123 = vector.shape_cast %122 : vector<8xf32> to vector<8x1xf32>
    %124 = vector.broadcast %123 : vector<8x1xf32> to vector<8x8xf32>
    %125 = arith.subf %121, %124 : vector<8x8xf32>
    %126 = math.exp %125 : vector<8x8xf32>
    %cst_38 = arith.constant dense<0.000000e+00> : vector<8xf32>
    %127 = vector.multi_reduction <add>, %126, %cst_38 [1] : vector<8x8xf32> to vector<8xf32>
    %128 = vector.shape_cast %127 : vector<8xf32> to vector<8x1xf32>
    %129 = vector.broadcast %128 : vector<8x1xf32> to vector<8x8xf32>
    %130 = arith.divf %126, %129 : vector<8x8xf32>
    %131 = arith.truncf %130 : vector<8x8xf32> to vector<8x8xbf16>
    %cst_39 = arith.constant dense<0.000000e+00> : vector<8x8xf32>
    %132 = tpu.matmul %131, %116, %cst_39 {dimension_numbers = #tpu.dot_dimension_numbers<[1], [0], [0], [1], [0, 0, 1, 1], [], []>} : vector<8x8xbf16>, vector<8x8xbf16>, vector<8x8xf32> -> vector<8x8xf32>
    %133 = vector.extract_strided_slice %82 {offsets = [0, 16], sizes = [8, 8], strides = [1, 1]} : vector<8x128xf32> to vector<8x8xf32>
    %134 = arith.truncf %133 : vector<8x8xf32> to vector<8x8xbf16>
    %135 = vector.extract_strided_slice %82 {offsets = [0, 48], sizes = [8, 8], strides = [1, 1]} : vector<8x128xf32> to vector<8x8xf32>
    %136 = arith.truncf %135 : vector<8x8xf32> to vector<8x8xbf16>
    %137 = vector.extract_strided_slice %82 {offsets = [0, 80], sizes = [8, 8], strides = [1, 1]} : vector<8x128xf32> to vector<8x8xf32>
    %138 = arith.truncf %137 : vector<8x8xf32> to vector<8x8xbf16>
    %cst_40 = arith.constant dense<0.000000e+00> : vector<8x8xf32>
    %139 = tpu.matmul %134, %136, %cst_40 {dimension_numbers = #tpu.dot_dimension_numbers<[1], [1], [0], [0], [0, 0, 1, 0], [], []>} : vector<8x8xbf16>, vector<8x8xbf16>, vector<8x8xf32> -> vector<8x8xf32>
    %cst_41 = arith.constant 0.353553385 : f32
    %140 = vector.broadcast %cst_41 : f32 to vector<8x8xf32>
    %141 = arith.mulf %139, %140 : vector<8x8xf32>
    %142 = vector.broadcast %88 : vector<1x8xf32> to vector<8x8xf32>
    %143 = arith.addf %141, %142 : vector<8x8xf32>
    %cst_42 = arith.constant dense<0xFF800000> : vector<8xf32>
    %144 = vector.multi_reduction <maximumf>, %143, %cst_42 [1] : vector<8x8xf32> to vector<8xf32>
    %145 = vector.shape_cast %144 : vector<8xf32> to vector<8x1xf32>
    %146 = vector.broadcast %145 : vector<8x1xf32> to vector<8x8xf32>
    %147 = arith.subf %143, %146 : vector<8x8xf32>
    %148 = math.exp %147 : vector<8x8xf32>
    %cst_43 = arith.constant dense<0.000000e+00> : vector<8xf32>
    %149 = vector.multi_reduction <add>, %148, %cst_43 [1] : vector<8x8xf32> to vector<8xf32>
    %150 = vector.shape_cast %149 : vector<8xf32> to vector<8x1xf32>
    %151 = vector.broadcast %150 : vector<8x1xf32> to vector<8x8xf32>
    %152 = arith.divf %148, %151 : vector<8x8xf32>
    %153 = arith.truncf %152 : vector<8x8xf32> to vector<8x8xbf16>
    %cst_44 = arith.constant dense<0.000000e+00> : vector<8x8xf32>
    %154 = tpu.matmul %153, %138, %cst_44 {dimension_numbers = #tpu.dot_dimension_numbers<[1], [0], [0], [1], [0, 0, 1, 1], [], []>} : vector<8x8xbf16>, vector<8x8xbf16>, vector<8x8xf32> -> vector<8x8xf32>
    %155 = vector.extract_strided_slice %82 {offsets = [0, 24], sizes = [8, 8], strides = [1, 1]} : vector<8x128xf32> to vector<8x8xf32>
    %156 = arith.truncf %155 : vector<8x8xf32> to vector<8x8xbf16>
    %157 = vector.extract_strided_slice %82 {offsets = [0, 56], sizes = [8, 8], strides = [1, 1]} : vector<8x128xf32> to vector<8x8xf32>
    %158 = arith.truncf %157 : vector<8x8xf32> to vector<8x8xbf16>
    %159 = vector.extract_strided_slice %82 {offsets = [0, 88], sizes = [8, 8], strides = [1, 1]} : vector<8x128xf32> to vector<8x8xf32>
    %160 = arith.truncf %159 : vector<8x8xf32> to vector<8x8xbf16>
    %cst_45 = arith.constant dense<0.000000e+00> : vector<8x8xf32>
    %161 = tpu.matmul %156, %158, %cst_45 {dimension_numbers = #tpu.dot_dimension_numbers<[1], [1], [0], [0], [0, 0, 1, 0], [], []>} : vector<8x8xbf16>, vector<8x8xbf16>, vector<8x8xf32> -> vector<8x8xf32>
    %cst_46 = arith.constant 0.353553385 : f32
    %162 = vector.broadcast %cst_46 : f32 to vector<8x8xf32>
    %163 = arith.mulf %161, %162 : vector<8x8xf32>
    %164 = vector.broadcast %88 : vector<1x8xf32> to vector<8x8xf32>
    %165 = arith.addf %163, %164 : vector<8x8xf32>
    %cst_47 = arith.constant dense<0xFF800000> : vector<8xf32>
    %166 = vector.multi_reduction <maximumf>, %165, %cst_47 [1] : vector<8x8xf32> to vector<8xf32>
    %167 = vector.shape_cast %166 : vector<8xf32> to vector<8x1xf32>
    %168 = vector.broadcast %167 : vector<8x1xf32> to vector<8x8xf32>
    %169 = arith.subf %165, %168 : vector<8x8xf32>
    %170 = math.exp %169 : vector<8x8xf32>
    %cst_48 = arith.constant dense<0.000000e+00> : vector<8xf32>
    %171 = vector.multi_reduction <add>, %170, %cst_48 [1] : vector<8x8xf32> to vector<8xf32>
    %172 = vector.shape_cast %171 : vector<8xf32> to vector<8x1xf32>
    %173 = vector.broadcast %172 : vector<8x1xf32> to vector<8x8xf32>
    %174 = arith.divf %170, %173 : vector<8x8xf32>
    %175 = arith.truncf %174 : vector<8x8xf32> to vector<8x8xbf16>
    %cst_49 = arith.constant dense<0.000000e+00> : vector<8x8xf32>
    %176 = tpu.matmul %175, %160, %cst_49 {dimension_numbers = #tpu.dot_dimension_numbers<[1], [0], [0], [1], [0, 0, 1, 1], [], []>} : vector<8x8xbf16>, vector<8x8xbf16>, vector<8x8xf32> -> vector<8x8xf32>
    %177 = tpu.concatenate %110, %132, %154, %176 in 1 : vector<8x8xf32>, vector<8x8xf32>, vector<8x8xf32>, vector<8x8xf32> -> vector<8x32xf32>
    %c0_50 = arith.constant 0 : index
    %c0_51 = arith.constant 0 : index
    %178 = vector.load %arg8[%c0_50, %c0_51] : memref<32x32xbf16, #tpu.memory_space<vmem>>, vector<32x32xbf16>
    %179 = arith.truncf %177 : vector<8x32xf32> to vector<8x32xbf16>
    %cst_52 = arith.constant dense<0.000000e+00> : vector<8x32xf32>
    %180 = tpu.matmul %179, %178, %cst_52 {dimension_numbers = #tpu.dot_dimension_numbers<[1], [0], [0], [1], [0, 0, 1, 1], [], []>} : vector<8x32xbf16>, vector<32x32xbf16>, vector<8x32xf32> -> vector<8x32xf32>
    %181 = arith.addf %55, %180 : vector<8x32xf32>
    %182 = tpu.iota {dimensions = array<i32: 0>} : vector<8x1xi32>
    %183 = vector.broadcast %1 : i32 to vector<8x1xi32>
    %184 = arith.cmpi slt, %182, %183 : vector<8x1xi32>
    %185 = arith.extui %184 : vector<8x1xi1> to vector<8x1xi32>
    %186 = arith.sitofp %185 : vector<8x1xi32> to vector<8x1xf32>
    %187 = vector.extract_strided_slice %2 {offsets = [5, 0], sizes = [1, 32], strides = [1, 1]} : vector<24x32xf32> to vector<1x32xf32>
    %188 = vector.extract_strided_slice %2 {offsets = [6, 0], sizes = [1, 32], strides = [1, 1]} : vector<24x32xf32> to vector<1x32xf32>
    %cst_53 = arith.constant dense<0.000000e+00> : vector<8xf32>
    %189 = vector.multi_reduction <add>, %181, %cst_53 [1] : vector<8x32xf32> to vector<8xf32>
    %190 = vector.shape_cast %189 : vector<8xf32> to vector<8x1xf32>
    %cst_54 = arith.constant 3.200000e+01 : f32
    %191 = vector.broadcast %cst_54 : f32 to vector<8x1xf32>
    %192 = arith.divf %190, %191 : vector<8x1xf32>
    %193 = vector.broadcast %192 : vector<8x1xf32> to vector<8x32xf32>
    %194 = arith.subf %181, %193 : vector<8x32xf32>
    %195 = arith.mulf %194, %194 : vector<8x32xf32>
    %cst_55 = arith.constant dense<0.000000e+00> : vector<8xf32>
    %196 = vector.multi_reduction <add>, %195, %cst_55 [1] : vector<8x32xf32> to vector<8xf32>
    %197 = vector.shape_cast %196 : vector<8xf32> to vector<8x1xf32>
    %cst_56 = arith.constant 3.200000e+01 : f32
    %198 = vector.broadcast %cst_56 : f32 to vector<8x1xf32>
    %199 = arith.divf %197, %198 : vector<8x1xf32>
    %200 = vector.broadcast %192 : vector<8x1xf32> to vector<8x32xf32>
    %201 = arith.subf %181, %200 : vector<8x32xf32>
    %cst_57 = arith.constant 9.99999974E-6 : f32
    %202 = vector.broadcast %cst_57 : f32 to vector<8x1xf32>
    %203 = arith.addf %199, %202 : vector<8x1xf32>
    %204 = math.rsqrt %203 : vector<8x1xf32>
    %205 = vector.broadcast %204 : vector<8x1xf32> to vector<8x32xf32>
    %206 = arith.mulf %201, %205 : vector<8x32xf32>
    %207 = vector.broadcast %187 : vector<1x32xf32> to vector<8x32xf32>
    %208 = arith.mulf %206, %207 : vector<8x32xf32>
    %209 = vector.broadcast %188 : vector<1x32xf32> to vector<8x32xf32>
    %210 = arith.addf %208, %209 : vector<8x32xf32>
    %211 = vector.broadcast %186 : vector<8x1xf32> to vector<8x32xf32>
    %212 = arith.mulf %210, %211 : vector<8x32xf32>
    %c0_58 = arith.constant 0 : index
    %c0_59 = arith.constant 0 : index
    %213 = vector.load %arg9[%c0_58, %c0_59] : memref<32x32xbf16, #tpu.memory_space<vmem>>, vector<32x32xbf16>
    %214 = arith.truncf %212 : vector<8x32xf32> to vector<8x32xbf16>
    %cst_60 = arith.constant dense<0.000000e+00> : vector<8x32xf32>
    %215 = tpu.matmul %214, %213, %cst_60 {dimension_numbers = #tpu.dot_dimension_numbers<[1], [0], [0], [1], [0, 0, 1, 1], [], []>} : vector<8x32xbf16>, vector<32x32xbf16>, vector<8x32xf32> -> vector<8x32xf32>
    %216 = vector.extract_strided_slice %2 {offsets = [7, 0], sizes = [1, 32], strides = [1, 1]} : vector<24x32xf32> to vector<1x32xf32>
    %217 = vector.broadcast %216 : vector<1x32xf32> to vector<8x32xf32>
    %218 = arith.addf %215, %217 : vector<8x32xf32>
    %c0_61 = arith.constant 0 : index
    %c0_62 = arith.constant 0 : index
    %219 = vector.load %arg10[%c0_61, %c0_62] : memref<32x32xbf16, #tpu.memory_space<vmem>>, vector<32x32xbf16>
    %220 = arith.truncf %212 : vector<8x32xf32> to vector<8x32xbf16>
    %cst_63 = arith.constant dense<0.000000e+00> : vector<8x32xf32>
    %221 = tpu.matmul %220, %219, %cst_63 {dimension_numbers = #tpu.dot_dimension_numbers<[1], [0], [0], [1], [0, 0, 1, 1], [], []>} : vector<8x32xbf16>, vector<32x32xbf16>, vector<8x32xf32> -> vector<8x32xf32>
    %222 = vector.extract_strided_slice %2 {offsets = [8, 0], sizes = [1, 32], strides = [1, 1]} : vector<24x32xf32> to vector<1x32xf32>
    %223 = vector.broadcast %222 : vector<1x32xf32> to vector<8x32xf32>
    %224 = arith.addf %221, %223 : vector<8x32xf32>
    %225 = arith.negf %224 : vector<8x32xf32>
    %226 = math.exp %225 : vector<8x32xf32>
    %cst_64 = arith.constant 1.000000e+00 : f32
    %227 = vector.broadcast %cst_64 : f32 to vector<8x32xf32>
    %228 = arith.addf %227, %226 : vector<8x32xf32>
    %229 = arith.divf %227, %228 : vector<8x32xf32>
    %230 = arith.mulf %218, %229 : vector<8x32xf32>
    %231 = vector.extract_strided_slice %2 {offsets = [20, 0], sizes = [1, 32], strides = [1, 1]} : vector<24x32xf32> to vector<1x32xf32>
    %232 = vector.broadcast %231 : vector<1x32xf32> to vector<8x32xf32>
    %233 = arith.mulf %230, %232 : vector<8x32xf32>
    %c2_i32 = arith.constant 2 : i32
    %234 = tpu.dynamic_rotate %230 by %c2_i32 dim 0 : vector<8x32xf32>, i32 -> vector<8x32xf32>
    %c2_i32_65 = arith.constant 2 : i32
    %235 = vector.broadcast %c2_i32_65 : i32 to vector<8x1xi32>
    %236 = arith.cmpi sge, %182, %235 : vector<8x1xi32>
    %237 = arith.extui %236 : vector<8x1xi1> to vector<8x1xi32>
    %238 = arith.sitofp %237 : vector<8x1xi32> to vector<8x1xf32>
    %239 = vector.broadcast %238 : vector<8x1xf32> to vector<8x32xf32>
    %240 = arith.mulf %234, %239 : vector<8x32xf32>
    %241 = vector.extract_strided_slice %2 {offsets = [18, 0], sizes = [1, 32], strides = [1, 1]} : vector<24x32xf32> to vector<1x32xf32>
    %242 = vector.broadcast %241 : vector<1x32xf32> to vector<8x32xf32>
    %243 = arith.mulf %240, %242 : vector<8x32xf32>
    %244 = arith.addf %233, %243 : vector<8x32xf32>
    %c1_i32 = arith.constant 1 : i32
    %245 = tpu.dynamic_rotate %230 by %c1_i32 dim 0 : vector<8x32xf32>, i32 -> vector<8x32xf32>
    %c1_i32_66 = arith.constant 1 : i32
    %246 = vector.broadcast %c1_i32_66 : i32 to vector<8x1xi32>
    %247 = arith.cmpi sge, %182, %246 : vector<8x1xi32>
    %248 = arith.extui %247 : vector<8x1xi1> to vector<8x1xi32>
    %249 = arith.sitofp %248 : vector<8x1xi32> to vector<8x1xf32>
    %250 = vector.broadcast %249 : vector<8x1xf32> to vector<8x32xf32>
    %251 = arith.mulf %245, %250 : vector<8x32xf32>
    %252 = vector.extract_strided_slice %2 {offsets = [19, 0], sizes = [1, 32], strides = [1, 1]} : vector<24x32xf32> to vector<1x32xf32>
    %253 = vector.broadcast %252 : vector<1x32xf32> to vector<8x32xf32>
    %254 = arith.mulf %251, %253 : vector<8x32xf32>
    %255 = arith.addf %244, %254 : vector<8x32xf32>
    %c7_i32 = arith.constant 7 : i32
    %256 = tpu.dynamic_rotate %230 by %c7_i32 dim 0 : vector<8x32xf32>, i32 -> vector<8x32xf32>
    %c7_i32_67 = arith.constant 7 : i32
    %257 = vector.broadcast %c7_i32_67 : i32 to vector<8x1xi32>
    %258 = arith.cmpi slt, %182, %257 : vector<8x1xi32>
    %259 = arith.extui %258 : vector<8x1xi1> to vector<8x1xi32>
    %260 = arith.sitofp %259 : vector<8x1xi32> to vector<8x1xf32>
    %261 = vector.broadcast %260 : vector<8x1xf32> to vector<8x32xf32>
    %262 = arith.mulf %256, %261 : vector<8x32xf32>
    %263 = vector.extract_strided_slice %2 {offsets = [21, 0], sizes = [1, 32], strides = [1, 1]} : vector<24x32xf32> to vector<1x32xf32>
    %264 = vector.broadcast %263 : vector<1x32xf32> to vector<8x32xf32>
    %265 = arith.mulf %262, %264 : vector<8x32xf32>
    %266 = arith.addf %255, %265 : vector<8x32xf32>
    %c6_i32 = arith.constant 6 : i32
    %267 = tpu.dynamic_rotate %230 by %c6_i32 dim 0 : vector<8x32xf32>, i32 -> vector<8x32xf32>
    %c6_i32_68 = arith.constant 6 : i32
    %268 = vector.broadcast %c6_i32_68 : i32 to vector<8x1xi32>
    %269 = arith.cmpi slt, %182, %268 : vector<8x1xi32>
    %270 = arith.extui %269 : vector<8x1xi1> to vector<8x1xi32>
    %271 = arith.sitofp %270 : vector<8x1xi32> to vector<8x1xf32>
    %272 = vector.broadcast %271 : vector<8x1xf32> to vector<8x32xf32>
    %273 = arith.mulf %267, %272 : vector<8x32xf32>
    %274 = vector.extract_strided_slice %2 {offsets = [22, 0], sizes = [1, 32], strides = [1, 1]} : vector<24x32xf32> to vector<1x32xf32>
    %275 = vector.broadcast %274 : vector<1x32xf32> to vector<8x32xf32>
    %276 = arith.mulf %273, %275 : vector<8x32xf32>
    %277 = arith.addf %266, %276 : vector<8x32xf32>
    %278 = vector.extract_strided_slice %2 {offsets = [9, 0], sizes = [1, 32], strides = [1, 1]} : vector<24x32xf32> to vector<1x32xf32>
    %279 = vector.broadcast %278 : vector<1x32xf32> to vector<8x32xf32>
    %280 = arith.addf %277, %279 : vector<8x32xf32>
    %281 = vector.extract_strided_slice %2 {offsets = [10, 0], sizes = [1, 32], strides = [1, 1]} : vector<24x32xf32> to vector<1x32xf32>
    %282 = vector.broadcast %281 : vector<1x32xf32> to vector<8x32xf32>
    %283 = arith.mulf %280, %282 : vector<8x32xf32>
    %284 = vector.extract_strided_slice %2 {offsets = [11, 0], sizes = [1, 32], strides = [1, 1]} : vector<24x32xf32> to vector<1x32xf32>
    %285 = vector.broadcast %284 : vector<1x32xf32> to vector<8x32xf32>
    %286 = arith.addf %283, %285 : vector<8x32xf32>
    %287 = arith.negf %286 : vector<8x32xf32>
    %288 = math.exp %287 : vector<8x32xf32>
    %cst_69 = arith.constant 1.000000e+00 : f32
    %289 = vector.broadcast %cst_69 : f32 to vector<8x32xf32>
    %290 = arith.addf %289, %288 : vector<8x32xf32>
    %291 = arith.divf %289, %290 : vector<8x32xf32>
    %292 = arith.mulf %286, %291 : vector<8x32xf32>
    %c0_70 = arith.constant 0 : index
    %c0_71 = arith.constant 0 : index
    %293 = vector.load %arg11[%c0_70, %c0_71] : memref<32x32xbf16, #tpu.memory_space<vmem>>, vector<32x32xbf16>
    %294 = arith.truncf %292 : vector<8x32xf32> to vector<8x32xbf16>
    %cst_72 = arith.constant dense<0.000000e+00> : vector<8x32xf32>
    %295 = tpu.matmul %294, %293, %cst_72 {dimension_numbers = #tpu.dot_dimension_numbers<[1], [0], [0], [1], [0, 0, 1, 1], [], []>} : vector<8x32xbf16>, vector<32x32xbf16>, vector<8x32xf32> -> vector<8x32xf32>
    %296 = vector.extract_strided_slice %2 {offsets = [12, 0], sizes = [1, 32], strides = [1, 1]} : vector<24x32xf32> to vector<1x32xf32>
    %297 = vector.broadcast %296 : vector<1x32xf32> to vector<8x32xf32>
    %298 = arith.addf %295, %297 : vector<8x32xf32>
    %299 = arith.addf %181, %298 : vector<8x32xf32>
    %300 = vector.extract_strided_slice %2 {offsets = [13, 0], sizes = [1, 32], strides = [1, 1]} : vector<24x32xf32> to vector<1x32xf32>
    %301 = vector.extract_strided_slice %2 {offsets = [14, 0], sizes = [1, 32], strides = [1, 1]} : vector<24x32xf32> to vector<1x32xf32>
    %cst_73 = arith.constant dense<0.000000e+00> : vector<8xf32>
    %302 = vector.multi_reduction <add>, %299, %cst_73 [1] : vector<8x32xf32> to vector<8xf32>
    %303 = vector.shape_cast %302 : vector<8xf32> to vector<8x1xf32>
    %cst_74 = arith.constant 3.200000e+01 : f32
    %304 = vector.broadcast %cst_74 : f32 to vector<8x1xf32>
    %305 = arith.divf %303, %304 : vector<8x1xf32>
    %306 = vector.broadcast %305 : vector<8x1xf32> to vector<8x32xf32>
    %307 = arith.subf %299, %306 : vector<8x32xf32>
    %308 = arith.mulf %307, %307 : vector<8x32xf32>
    %cst_75 = arith.constant dense<0.000000e+00> : vector<8xf32>
    %309 = vector.multi_reduction <add>, %308, %cst_75 [1] : vector<8x32xf32> to vector<8xf32>
    %310 = vector.shape_cast %309 : vector<8xf32> to vector<8x1xf32>
    %cst_76 = arith.constant 3.200000e+01 : f32
    %311 = vector.broadcast %cst_76 : f32 to vector<8x1xf32>
    %312 = arith.divf %310, %311 : vector<8x1xf32>
    %313 = vector.broadcast %305 : vector<8x1xf32> to vector<8x32xf32>
    %314 = arith.subf %299, %313 : vector<8x32xf32>
    %cst_77 = arith.constant 9.99999974E-6 : f32
    %315 = vector.broadcast %cst_77 : f32 to vector<8x1xf32>
    %316 = arith.addf %312, %315 : vector<8x1xf32>
    %317 = math.rsqrt %316 : vector<8x1xf32>
    %318 = vector.broadcast %317 : vector<8x1xf32> to vector<8x32xf32>
    %319 = arith.mulf %314, %318 : vector<8x32xf32>
    %320 = vector.broadcast %300 : vector<1x32xf32> to vector<8x32xf32>
    %321 = arith.mulf %319, %320 : vector<8x32xf32>
    %322 = vector.broadcast %301 : vector<1x32xf32> to vector<8x32xf32>
    %323 = arith.addf %321, %322 : vector<8x32xf32>
    %c0_78 = arith.constant 0 : index
    %c0_79 = arith.constant 0 : index
    %324 = vector.load %arg12[%c0_78, %c0_79] : memref<32x128xbf16, #tpu.memory_space<vmem>>, vector<32x128xbf16>
    %325 = arith.truncf %323 : vector<8x32xf32> to vector<8x32xbf16>
    %cst_80 = arith.constant dense<0.000000e+00> : vector<8x128xf32>
    %326 = tpu.matmul %325, %324, %cst_80 {dimension_numbers = #tpu.dot_dimension_numbers<[1], [0], [0], [1], [0, 0, 1, 1], [], []>} : vector<8x32xbf16>, vector<32x128xbf16>, vector<8x128xf32> -> vector<8x128xf32>
    %c1 = arith.constant 1 : index
    %c0_81 = arith.constant 0 : index
    %327 = vector.load %arg4[%c1, %c0_81] : memref<2x128xf32, #tpu.memory_space<vmem>>, vector<1x128xf32>
    %328 = vector.broadcast %327 : vector<1x128xf32> to vector<8x128xf32>
    %329 = arith.addf %326, %328 : vector<8x128xf32>
    %cst_82 = arith.constant 5.000000e-01 : f32
    %330 = vector.broadcast %cst_82 : f32 to vector<8x128xf32>
    %331 = arith.mulf %330, %329 : vector<8x128xf32>
    %cst_83 = arith.constant 4.471500e-02 : f32
    %332 = vector.broadcast %cst_83 : f32 to vector<8x128xf32>
    %333 = arith.mulf %332, %329 : vector<8x128xf32>
    %334 = arith.mulf %333, %329 : vector<8x128xf32>
    %335 = arith.mulf %334, %329 : vector<8x128xf32>
    %336 = arith.addf %329, %335 : vector<8x128xf32>
    %cst_84 = arith.constant 0.797884583 : f32
    %337 = vector.broadcast %cst_84 : f32 to vector<8x128xf32>
    %338 = arith.mulf %337, %336 : vector<8x128xf32>
    %339 = math.tanh %338 : vector<8x128xf32>
    %cst_85 = arith.constant 1.000000e+00 : f32
    %340 = vector.broadcast %cst_85 : f32 to vector<8x128xf32>
    %341 = arith.addf %340, %339 : vector<8x128xf32>
    %342 = arith.mulf %331, %341 : vector<8x128xf32>
    %c0_86 = arith.constant 0 : index
    %c0_87 = arith.constant 0 : index
    %343 = vector.load %arg13[%c0_86, %c0_87] : memref<128x32xbf16, #tpu.memory_space<vmem>>, vector<128x32xbf16>
    %344 = arith.truncf %342 : vector<8x128xf32> to vector<8x128xbf16>
    %cst_88 = arith.constant dense<0.000000e+00> : vector<8x32xf32>
    %345 = tpu.matmul %344, %343, %cst_88 {dimension_numbers = #tpu.dot_dimension_numbers<[1], [0], [0], [1], [0, 0, 1, 1], [], []>} : vector<8x128xbf16>, vector<128x32xbf16>, vector<8x32xf32> -> vector<8x32xf32>
    %346 = vector.extract_strided_slice %2 {offsets = [15, 0], sizes = [1, 32], strides = [1, 1]} : vector<24x32xf32> to vector<1x32xf32>
    %347 = vector.broadcast %346 : vector<1x32xf32> to vector<8x32xf32>
    %348 = arith.addf %345, %347 : vector<8x32xf32>
    %cst_89 = arith.constant 5.000000e-01 : f32
    %349 = vector.broadcast %cst_89 : f32 to vector<8x32xf32>
    %350 = arith.mulf %349, %348 : vector<8x32xf32>
    %351 = arith.addf %299, %350 : vector<8x32xf32>
    %352 = vector.extract_strided_slice %2 {offsets = [16, 0], sizes = [1, 32], strides = [1, 1]} : vector<24x32xf32> to vector<1x32xf32>
    %353 = vector.extract_strided_slice %2 {offsets = [17, 0], sizes = [1, 32], strides = [1, 1]} : vector<24x32xf32> to vector<1x32xf32>
    %cst_90 = arith.constant dense<0.000000e+00> : vector<8xf32>
    %354 = vector.multi_reduction <add>, %351, %cst_90 [1] : vector<8x32xf32> to vector<8xf32>
    %355 = vector.shape_cast %354 : vector<8xf32> to vector<8x1xf32>
    %cst_91 = arith.constant 3.200000e+01 : f32
    %356 = vector.broadcast %cst_91 : f32 to vector<8x1xf32>
    %357 = arith.divf %355, %356 : vector<8x1xf32>
    %358 = vector.broadcast %357 : vector<8x1xf32> to vector<8x32xf32>
    %359 = arith.subf %351, %358 : vector<8x32xf32>
    %360 = arith.mulf %359, %359 : vector<8x32xf32>
    %cst_92 = arith.constant dense<0.000000e+00> : vector<8xf32>
    %361 = vector.multi_reduction <add>, %360, %cst_92 [1] : vector<8x32xf32> to vector<8xf32>
    %362 = vector.shape_cast %361 : vector<8xf32> to vector<8x1xf32>
    %cst_93 = arith.constant 3.200000e+01 : f32
    %363 = vector.broadcast %cst_93 : f32 to vector<8x1xf32>
    %364 = arith.divf %362, %363 : vector<8x1xf32>
    %365 = vector.broadcast %357 : vector<8x1xf32> to vector<8x32xf32>
    %366 = arith.subf %351, %365 : vector<8x32xf32>
    %cst_94 = arith.constant 9.99999974E-6 : f32
    %367 = vector.broadcast %cst_94 : f32 to vector<8x1xf32>
    %368 = arith.addf %364, %367 : vector<8x1xf32>
    %369 = math.rsqrt %368 : vector<8x1xf32>
    %370 = vector.broadcast %369 : vector<8x1xf32> to vector<8x32xf32>
    %371 = arith.mulf %366, %370 : vector<8x32xf32>
    %372 = vector.broadcast %352 : vector<1x32xf32> to vector<8x32xf32>
    %373 = arith.mulf %371, %372 : vector<8x32xf32>
    %374 = vector.broadcast %353 : vector<1x32xf32> to vector<8x32xf32>
    %375 = arith.addf %373, %374 : vector<8x32xf32>
    %c0_95 = arith.constant 0 : index
    %c0_96 = arith.constant 0 : index
    %376 = vector.load %arg14[%c0_95, %c0_96] : memref<8x32xf32, #tpu.memory_space<vmem>>, vector<8x32xf32>
    tpu.vector_store %arg14[%c0_95, %c0_96], %375 {strides = array<i32>} : memref<8x32xf32, #tpu.memory_space<vmem>>, vector<8x32xf32>,
    return
  }
  func.func @transform_0(%arg0: i32, %arg1: memref<2xi32, #tpu.memory_space<smem>>) -> (i32, i32) {
    %c0_i32 = arith.constant 0 : i32
    %c0_i32_0 = arith.constant 0 : i32
    return %arg0, %c0_i32 : i32, i32
  }
  func.func @transform_1(%arg0: i32, %arg1: memref<2xi32, #tpu.memory_space<smem>>) -> (i32, i32) {
    %c0_i32 = arith.constant 0 : i32
    %c0_i32_0 = arith.constant 0 : i32
    %c0_i32_1 = arith.constant 0 : i32
    return %c0_i32, %c0_i32_0 : i32, i32
  }
  func.func @transform_2(%arg0: i32, %arg1: memref<2xi32, #tpu.memory_space<smem>>) -> (i32, i32) {
    %c0_i32 = arith.constant 0 : i32
    %c0_i32_0 = arith.constant 0 : i32
    %c0_i32_1 = arith.constant 0 : i32
    return %c0_i32, %c0_i32_0 : i32, i32
  }
  func.func @transform_3(%arg0: i32, %arg1: memref<2xi32, #tpu.memory_space<smem>>) -> (i32, i32) {
    %c0_i32 = arith.constant 0 : i32
    %c0_i32_0 = arith.constant 0 : i32
    %c0_i32_1 = arith.constant 0 : i32
    return %c0_i32, %c0_i32_0 : i32, i32
  }
  func.func @transform_4(%arg0: i32, %arg1: memref<2xi32, #tpu.memory_space<smem>>) -> (i32, i32) {
    %c0_i32 = arith.constant 0 : i32
    %c0_i32_0 = arith.constant 0 : i32
    %c0_i32_1 = arith.constant 0 : i32
    return %c0_i32, %c0_i32_0 : i32, i32
  }
  func.func @transform_5(%arg0: i32, %arg1: memref<2xi32, #tpu.memory_space<smem>>) -> (i32, i32) {
    %c0_i32 = arith.constant 0 : i32
    %c0_i32_0 = arith.constant 0 : i32
    %c0_i32_1 = arith.constant 0 : i32
    return %c0_i32, %c0_i32_0 : i32, i32
  }
  func.func @transform_6(%arg0: i32, %arg1: memref<2xi32, #tpu.memory_space<smem>>) -> (i32, i32) {
    %c0_i32 = arith.constant 0 : i32
    %c0_i32_0 = arith.constant 0 : i32
    %c0_i32_1 = arith.constant 0 : i32
    return %c0_i32, %c0_i32_0 : i32, i32
  }
  func.func @transform_7(%arg0: i32, %arg1: memref<2xi32, #tpu.memory_space<smem>>) -> (i32, i32) {
    %c0_i32 = arith.constant 0 : i32
    %c0_i32_0 = arith.constant 0 : i32
    %c0_i32_1 = arith.constant 0 : i32
    return %c0_i32, %c0_i32_0 : i32, i32
  }
  func.func @transform_8(%arg0: i32, %arg1: memref<2xi32, #tpu.memory_space<smem>>) -> (i32, i32) {
    %c0_i32 = arith.constant 0 : i32
    %c0_i32_0 = arith.constant 0 : i32
    %c0_i32_1 = arith.constant 0 : i32
    return %c0_i32, %c0_i32_0 : i32, i32
  }
  func.func @transform_9(%arg0: i32, %arg1: memref<2xi32, #tpu.memory_space<smem>>) -> (i32, i32) {
    %c0_i32 = arith.constant 0 : i32
    %c0_i32_0 = arith.constant 0 : i32
    %c0_i32_1 = arith.constant 0 : i32
    return %c0_i32, %c0_i32_0 : i32, i32
  }
  func.func @transform_10(%arg0: i32, %arg1: memref<2xi32, #tpu.memory_space<smem>>) -> (i32, i32) {
    %c0_i32 = arith.constant 0 : i32
    %c0_i32_0 = arith.constant 0 : i32
    %c0_i32_1 = arith.constant 0 : i32
    return %c0_i32, %c0_i32_0 : i32, i32
  }
  func.func @transform_11(%arg0: i32, %arg1: memref<2xi32, #tpu.memory_space<smem>>) -> (i32, i32) {
    %c0_i32 = arith.constant 0 : i32
    %c0_i32_0 = arith.constant 0 : i32
    %c0_i32_1 = arith.constant 0 : i32
    return %c0_i32, %c0_i32_0 : i32, i32
  }
  func.func @transform_12(%arg0: i32, %arg1: memref<2xi32, #tpu.memory_space<smem>>) -> (i32, i32) {
    %c0_i32 = arith.constant 0 : i32
    %c0_i32_0 = arith.constant 0 : i32
    return %arg0, %c0_i32 : i32, i32
  }
}

</mosaic_0001>

<bundles_post_ra>
// kernel: tpu_custom_call.1
= control target key start
LH: loop header
LB: loop body
LE: loop exit
PB: predicated region body
PF: predicated region fallthrough
CT: control target
= control target key end

     0   :  { %s2934_s0 = inlined_call_operand.vmem [shape: s32[2], index: 0, kind: input, shape index: {}]   ;;  %s2935_s1 = inlined_call_operand.vmem [shape: f32[16,32], index: 1, kind: input, shape index: {}]   ;;  %s2936_s2 = inlined_call_operand.vmem [shape: f32[24,32], index: 2, kind: input, shape index: {}]   ;;  %s2937_s3 = inlined_call_operand.hbm [shape: f32[2,128], index: 3, kind: input, shape index: {}]   ;;  %s2938_s4 = inlined_call_operand.vmem [shape: bf16[32,128], index: 4, kind: input, shape index: {}]   ;;  %s2939_s5 = inlined_call_operand.vmem [shape: bf16[128,32], index: 5, kind: input, shape index: {}]   ;;  %s2940_s6 = inlined_call_operand.vmem [shape: bf16[32,128], index: 6, kind: input, shape index: {}]   ;;  %s2941_s7 = inlined_call_operand.vmem [shape: bf16[32,32], index: 7, kind: input, shape index: {}]   ;;  %s2942_s8 = inlined_call_operand.vmem [shape: bf16[32,32], index: 8, kind: input, shape index: {}]   ;;  %s2943_s9 = inlined_call_operand.vmem [shape: bf16[32,32], index: 9, kind: input, shape index: {}]   ;;  %s2944_s10 = inlined_call_operand.vmem [shape: bf16[32,32], index: 10, kind: input, shape index: {}]   ;;  %s2945_s11 = inlined_call_operand.vmem [shape: bf16[32,128], index: 11, kind: input, shape index: {}]   ;;  %s2946_s12 = inlined_call_operand.vmem [shape: bf16[128,32], index: 12, kind: input, shape index: {}]   ;;  %s2947_s13 = inlined_call_operand.hbm [shape: f32[16,32], index: 13, kind: output, shape index: {}]  }
   0x1   :  { %2948 = sst [smem:[#allocation11_spill]] %s2935_s1  ;;  %s18_s27 = sshll.u32 %s2934_s0, 4  ;;  %s19_s27 = int_to_ptr.vmem [resolvable:$true] %s18_s27 }
   0x2   :  { %2949 = sst [smem:[#allocation12_spill]] %s2936_s2  ;;  %s2275_s28 = scalar_lea.vmem %s19_s27, 16 }
   0x3   :  { %2950 = sst [smem:[#allocation13_spill]] %s2937_s3  ;;  %p2276_p0 = scmp.ne.s32.totalorder %s19_s27, %s2275_s28 }
   0x4   :  { %p2280_p1 = scmp.lt.s32.totalorder %s19_s27, %s19_s27  ;;  %p2281_p2 = scmp.lt.s32.totalorder %s2275_s28, %s2275_s28 }
   0x6   :  { %p2282_p3 = por %p2281_p2, %p2280_p1 }
   0x8   :  { %p2283_p4 = pnand %p2282_p3, %p2276_p0 }
   0xa   :  { %2286 = shalt.err (!%p2283_p4)  }
   0xb   :  { %s2381_s29 = smov [#allocation3]  }
   0xc   :  { %21 = dma.vmem_to_smem %s19_s27, 16, %s2381_s29, [#allocation2] }
   0xd   :  { %2355 = dma.done.wait [#allocation2], 16 }
   0xe   :  { %2356 = vsyncadd [#allocation2], 4294967280 }
   0xf   :  { %23 = sfence }
  0x10   :  { %24 = vsyncpa [#allocation5], 0 }
  0x11   :  { %25 = vsyncpa [#allocation6], 0 }
  0x12   :  { %27 = vsyncpa [#allocation6 + $0x1], 0  ;;  %s2474_s30 = smov 0   ;;  %s2476_s14 = smov 0  }
  0x13   :  { %s2478_s0 = smov 0   ;;  %s2480_s15 = smov 0  }
  0x14 LB: > { %s2495_s16 = sadd.s32 4294967295, %s2379_s15   ;;  %s1874_s17 = sadd.s32 4294967294, %s2379_s15   ;;  %s2379_s15 = sphi %s2480_s15, %s2961_s15   ;;  %s2375_s0 = sphi %s2478_s0, %s2960_s0   ;;  %s2371_s14 = sphi %s2476_s14, %s2959_s14   ;;  %s2367_s30 = sphi %s2474_s30, %s2958_s30  }
  0x15   : > { %s2499_s18 = sadd.s32 1, %s2379_s15   ;;  %s297_s19 = sadd.s32 1, %s2375_s0 }
  0x16   : > { %s294_s20 = ssub.s32 %s2379_s15, %s2499_s18  ;;  %p307_p5 = scmp.ne.s32.totalorder %s2375_s0, %s2371_s14 }
  0x17   : > { %p295_p6 = scmp.eq.s32.totalorder %s294_s20, 0  ;;  %p308_p7 = scmp.eq.s32.totalorder %s2495_s16, 1 }
  0x18   : > { %p313_p8 = scmp.ne.s32.totalorder %s2371_s14, %s2367_s30  ;;  %p314_p9 = scmp.eq.s32.totalorder %s1874_s17, 1 }
  0x19   : > { %s2510_s21 = scalar_select %p295_p6, %s2375_s0, %s297_s19  }
  0x1a   : > { %p2512_p10 = por %p308_p7, %p307_p5  ;;  %p2516_p11 = por %p314_p9, %p313_p8 }
  0x1b   : > { %p1875_p12 = scmp.ge.s32.totalorder %s2379_s15, 1  ;;  %p321_p13 = scmp.lt.s32.totalorder %s2379_s15, 3 }
  0x1c   : > { %s2952_s23 = scalar_select %p2516_p11, 1, 0 }
  0x1d   : > { %p2153_p0 = scmp.eq.s32.totalorder %s2495_s16, 0  ;;  %p2523_p1 = pnand %p1875_p12, %p321_p13 }
  0x1e   : > { %s2382_s25 = smov [#allocation4]  }
  0x1f   : > { %s337_s26 = sshll.u32 %s2382_s25, 4  ;;  %p2145_p2 = pneg %p2523_p1  ;;  %s338_s26 = int_to_ptr.vmem [resolvable:$true] %s337_s26 }
  0x20   : > { %s2298_s27 = scalar_lea.vmem %s338_s26, 32  ;;  %p2306_p8 = scmp.lt.s32.totalorder %s338_s26, %s338_s26 }
  0x21   : > { %p2146_p3 = pnand %p2153_p0, %p2145_p2  ;;  %p2299_p5 = scmp.ne.s32.totalorder %s338_s26, %s2298_s27 }
  0x22   : > { %p2307_p9 = scmp.lt.s32.totalorder %s2298_s27, %s2298_s27 }
  0x23   : > { %p2289_p4 = pneg %p2146_p3 }
  0x24   : > { %p2308_p11 = por %p2307_p9, %p2306_p8 }
  0x25   : > { %p2301_p6 = pnand %p2299_p5, %p2289_p4 }
  0x27   : > { %p2302_p7 = pneg %p2301_p6 }
  0x29   : > { %p2309_p12 = pnand %p2308_p11, %p2302_p7 }
  0x2b   : > { %2312 = shalt.err (!%p2309_p12)
}
  0x2c   : > { %s2954_s3 = sld [smem:[#allocation13_spill]] }
  0x2e   : > { %384 = sbr.rel (%p2523_p1) target bundleno = 5334 (0x14d6), region = 68 }
  0x32   : > { %2148 = dma.hbm_to_vmem [thread:$0]  (!%p2146_p3), %s2954_s3, 32, %s338_s26, [#allocation5]  }
  0x33   : > { %2358 = dma.done.wait (%p2153_p0), [#allocation5], 32  }
  0x34   : > { %2360 = vsyncadd (%p2153_p0), [#allocation5], 4294967264  ;;  %p425_p13 = scmp.lt.s32.totalorder %s2495_s16, 1  ;;  %s2955_s1 = sld [smem:[#allocation11_spill]]  ;;  %vm435_vm0 = vcmask 261120   ;;  %v2207_v7 = vld [vmem:[%s2938_s4 + $0x8] sm:$0xff]   ;;  %v450_v13 = vlaneseq }
  0x35   : > { %v2383_v8 = vmov 0.0   ;;  %vm2384_vm1 = vmmov 0   ;;  %v2208_v9 = vld [vmem:[%s2938_s4] sm:$0xff]   ;;  %s2956_s2 = sld [smem:[#allocation12_spill]]  ;;  %v2209_v25 = vld [vmem:[%s2939_s5 + $0x38] sm:$0xff]   ;;  %v2210_v26 = vld [vmem:[%s2939_s5 + $0x30] sm:$0xff]  }
  0x36   : > { %s426_s17 = scalar_select %p425_p13, %s2495_s16, 1  ;;  %1995 = vmatprep.subr.bf16.mxu0 %v2383_v8  ;;  %1999 = vmatprep.mubr.msk.bf16.mxu0 %vm2384_vm1, %v2383_v8  ;;  %v2566_v14 = vshrl.u32 %v450_v13, 7  ;;  %v2211_v27 = vld [vmem:[%s2939_s5 + $0x28] sm:$0xff]   ;;  %v2212_v28 = vld [vmem:[%s2939_s5 + $0x20] sm:$0xff]   ;;  %v2213_v29 = vld [vmem:[%s2939_s5 + $0x18] sm:$0xff]   ;;  %vm737_vm2 = vcmask 64512  }
  0x37   : > { %1996 = vmatpush3.bf16.msra.mxu0 %v2207_v7  ;;  %2003 = vmatprep.subr.bf16.mxu1 %v2383_v8  ;;  %v2214_v30 = vld [vmem:[%s2939_s5 + $0x10] sm:$0xff]   ;;  %v2215_v31 = vld [vmem:[%s2939_s5 + $0x8] sm:$0xff]   ;;  %v2216_v32 = vld [vmem:[%s2939_s5] sm:$0xff]   ;;  %s2386_s24 = smov 88   ;;  %s2664_s26 = sld [smem:[#allocation3 + %s2495_s16]]  ;;  %vm803_vm4 = vcmask 1043456  }
  0x38   : > { %s1881_s19 = sshll.u32 %s426_s17, 3  ;;  %1997 = vmatprep.subr.bf16.mxu0 %v2383_v8  ;;  %2019 = vmatprep.mubr.msk.bf16.mxu1 %vm2384_vm1, %v2383_v8  ;;  %v2569_v15 = vsub.s32 0, %v2566_v14  ;;  %v2577_v17 = vsub.s32 1, %v2566_v14  ;;  %v1882_v33 = vld [vmem:[#allocation4] ss:$0 sm:$0xff]  ;;  %v2621_v49 = vsub.s32 2, %v2566_v14 }
  0x39   : > { %2004 = vmatpush3.bf16.msra.mxu1 %v2209_v25  ;;  %s2388_s28 = smov 64   ;;  %s2389_s29 = smov 120   ;;  %vm1196_vm5 = vcmask 130048   ;;  %vm1198_vm6 = vcmask 195584   ;;  %vm1427_vm8 = vcmp.ge.s32.totalorder %v2566_v14, 2  ;;  %vm1438_vm9 = vcmp.ge.s32.totalorder %v2566_v14, 1 }
  0x3a   : > { %s428_s27 = scalar_lea.vmem %s2955_s1, %s1881_s19  ;;  %2005 = vmatprep.subr.bf16.mxu1 %v2383_v8  ;;  %s2390_s17 = smov 56   ;;  %vm1449_vm10 = vcmp.lt.s32.totalorder %v2566_v14, 7  ;;  %vm1460_vm11 = vcmp.lt.s32.totalorder %v2566_v14, 6 }
  0x3b   : > { %v2545_v0 = vld [vmem:[%s428_s27] sm:$0xff]  ;;  %1998 = vmatpush3.bf16.msra.mxu0 %v2208_v9  ;;  %s2385_s27 = smov 96   ;;  %s2391_s19 = smov 112  }
  0x3c   : > { %v436_v1 = vsel %vm435_vm0, %v2545_v0, 0.0  ;;  %2023 = vmatprep.subr.bf16.mxu0 %v2383_v8  ;;  %v2574_v16 = vld [vmem:[%s2956_s2] sm:$0xff]  ;;  %s2392_s20 = smov 104   ;;  %s2393_s25 = smov 80  }
  0x3d   : > { %437 = vadd.xlane.f32.xlu0 %v436_v1  ;;  %v453_v18 = vrot.slane %v2574_v16, %v2569_v15  ;;  %v458_v21 = vrot.slane %v2574_v16, %v2577_v17  ;;  %2006 = vmatpush3.bf16.msra.mxu1 %v2210_v26  ;;  %v554_v50 = vrot.slane %v2574_v16, %v2621_v49  ;;  %v2217_v1 = vld [vmem:[%s2940_s6 + $0x8] sm:$0xff]  }
  0x3e   : > { %2007 = vmatprep.subr.bf16.mxu1 %v2383_v8 }
  0x41   : > { %2008 = vmatpush3.bf16.msra.mxu1 %v2211_v27  ;;  %v729_v27 = vand.u32 127, %v450_v13 }
  0x42   : > { %2009 = vmatprep.subr.bf16.mxu1 %v2383_v8 }
  0x45   : > { %2010 = vmatpush3.bf16.msra.mxu1 %v2212_v28  ;;  %v730_v28 = vstv %s2664_s26 }
  0x46   : > { %2011 = vmatprep.subr.bf16.mxu1 %v2383_v8  ;;  %vm731_vm3 = vcmp.lt.s32.totalorder %v729_v27, %v730_v28  ;;  %vm1263_vm7 = vcmp.lt.s32.totalorder %v2566_v14, %v730_v28  ;;  %v2225_v28 = vld [vmem:[%s2944_s10 + $0x8] sm:$0xff]  }
  0x49   : > { %2012 = vmatpush3.bf16.msra.mxu1 %v2213_v29 }
  0x4a   : > { %2013 = vmatprep.subr.bf16.mxu1 %v2383_v8 }
  0x4d   : > { %2014 = vmatpush3.bf16.msra.mxu1 %v2214_v30  ;;  %v2387_v30 = vmov -1e+09  }
  0x4e   : > { %2015 = vmatprep.subr.bf16.mxu1 %v2383_v8 }
  0x51   : > { %2016 = vmatpush3.bf16.msra.mxu1 %v2215_v31  ;;  %v2670_v31 = vsel %vm731_vm3, 0.0, %v2387_v30 }
  0x52   : > { %2017 = vmatprep.subr.bf16.mxu1 %v2383_v8 }
  0x55   : > { %2018 = vmatpush3.bf16.msra.mxu1 %v2216_v32 }
  0x56   : > { %2061 = vmatprep.subr.bf16.mxu1 %v2383_v8 }
  0xc6   : > { %v438_v2 = vpop.xlane.xlu0 %437 }
  0xc7   : > { %v440_v3 = vmul.f32 0.03125, %v438_v2 }
  0xc9   : > { %v441_v4 = vsub.f32 %v2545_v0, %v440_v3 }
  0xcb   : > { %v442_v5 = vmul.f32 %v441_v4, %v441_v4 }
  0xcd   : > { %v443_v6 = vsel %vm435_vm0, %v442_v5, 0.0  ;;  %v2641_v5 = vsub.s32 3, %v2566_v14 }
  0xce   : > { %444 = vadd.xlane.f32.xlu0 %v443_v6  ;;  %v2644_v6 = vsub.s32 4, %v2566_v14 }
  0xcf   : > { %v661_v7 = vrot.slane %v2574_v16, %v2641_v5 }
 0x157   : > { %v445_v10 = vpop.xlane.xlu0 %444 }
 0x158   : > { %v446_v11 = vmul.f32 0.03125, %v445_v10 }
 0x15a   : > { %v447_v12 = vadd.f32 1e-05, %v446_v11  ;;  %v666_v11 = vrot.slane %v2574_v16, %v2644_v6 }
 0x15c   : > { %2237 = vrsqrt.f32 %v447_v12 }
 0x169   : > { %v2238_v19 = vpop.eup %2237 }
 0x16a   : > { %v449_v20 = vmul.f32 %v2238_v19, %v441_v4 }
 0x16c   : > { %v454_v22 = vmul.f32 %v453_v18, %v449_v20 }
 0x16e   : > { %v459_v23 = vadd.f32 %v458_v21, %v454_v22 }
 0x170   : > { %v464_v24 = vpack.c.bf16 %v459_v23, %v459_v23 }
 0x172   : > { %2000 = vmatmul.mubr.msk.bf16.vlgmr.msra.gmra.mxu0 %vm435_vm0, %v464_v24 }
 0x173   : > { %2027 = vmatprep.mubr.msk.bf16.mxu0 %vm2384_vm1, %v2383_v8  ;;  %2024 = vmatpush3.bf16.msra.mxu0 %v2217_v1 }
 0x174   : > { %2025 = vmatprep.subr.bf16.mxu0 %v2383_v8 }
 0x232   : > { %v519_v34 = vpop.f32.mrf.mxu0 }
 0x233   : > { %v520_v35 = vadd.f32 %v1882_v33, %v519_v34 }
 0x234   : > { %v2001_v36 = vpop.f32.mrf.mxu0 }
 0x235   : > { %v526_v37 = vmul.f32 0.044715, %v520_v35  ;;  %v525_v45 = vmul.f32 0.5, %v520_v35 }
 0x236   : > { %v522_v38 = vpop.f32.mrf.mxu0 }
 0x237   : > { %v527_v39 = vmul.f32 %v526_v37, %v520_v35 }
 0x238   : > { %v2002_v40 = vpop.f32.mrf.mxu0 }
 0x239   : > { %v528_v41 = vmul.f32 %v527_v39, %v520_v35 }
 0x23b   : > { %v529_v42 = vadd.f32 %v528_v41, %v520_v35 }
 0x23d   : > { %v530_v43 = vmul.f32 0.7978846, %v529_v42 }
 0x23f   : > { %2239 = vtanh.f32 %v530_v43 }
 0x24c   : > { %v2240_v44 = vpop.eup %2239 }
 0x24d   : > { %v532_v46 = vadd.f32 1.0, %v2240_v44 }
 0x24f   : > { %v533_v47 = vmul.f32 %v532_v46, %v525_v45 }
 0x251   : > { %v550_v48 = vpack.c.bf16 %v533_v47, %v533_v47 }
 0x253   : > { %2020 = vmatmul.mubr.bf16.vlgmr.msra.gmra.mxu1 %v550_v48 }
 0x254   : > { %2063 = vmatprep.mubr.msk.bf16.mxu1 %vm2384_vm1, %v2383_v8 }
 0x313   : > { %v637_v51 = vpop.f32.mrf.mxu1 }
 0x314   : > { %v638_v52 = vadd.f32 %v637_v51, %v554_v50 }
 0x315   : > { %v2021_v53 = vpop.f32.mrf.mxu1 }
 0x316   : > { %v643_v54 = vmul.f32 0.5, %v638_v52 }
 0x317   : > { %v640_v55 = vpop.f32.mrf.mxu1 }
 0x318   : > { %v2626_v56 = vadd.f32 %v643_v54, %v2545_v0  ;;  %v2218_v0 = vld [vmem:[%s2940_s6] sm:$0xff]  }
 0x319   : > { %v2022_v57 = vpop.f32.mrf.mxu1  ;;  %2026 = vmatpush3.bf16.msra.mxu0 %v2218_v0 }
 0x31a   : > { %v645_v58 = vsel %vm435_vm0, %v2626_v56, 0.0  ;;  %2031 = vmatprep.subr.bf16.mxu0 %v2383_v8 }
 0x31b   : > { %646 = vadd.xlane.f32.xlu1 %v645_v58 }
 0x3a4   : > { %v647_v59 = vpop.xlane.xlu1 %646 }
 0x3a5   : > { %v648_v60 = vmul.f32 0.03125, %v647_v59 }
 0x3a7   : > { %v649_v61 = vsub.f32 %v2626_v56, %v648_v60 }
 0x3a9   : > { %v650_v62 = vmul.f32 %v649_v61, %v649_v61 }
 0x3ab   : > { %v651_v63 = vsel %vm435_vm0, %v650_v62, 0.0 }
 0x3ac   : > { %652 = vadd.xlane.f32.xlu1 %v651_v63 }
 0x435   : > { %v653_v2 = vpop.xlane.xlu1 %652 }
 0x436   : > { %v654_v3 = vmul.f32 0.03125, %v653_v2 }
 0x438   : > { %v655_v4 = vadd.f32 1e-05, %v654_v3 }
 0x43a   : > { %2241 = vrsqrt.f32 %v655_v4 }
 0x447   : > { %v2242_v9 = vpop.eup %2241 }
 0x448   : > { %v657_v10 = vmul.f32 %v2242_v9, %v649_v61 }
 0x44a   : > { %v662_v12 = vmul.f32 %v661_v7, %v657_v10 }
 0x44c   : > { %v667_v18 = vadd.f32 %v666_v11, %v662_v12 }
 0x44e   : > { %v672_v19 = vpack.c.bf16 %v667_v18, %v667_v18 }
 0x450   : > { %2028 = vmatmul.mubr.msk.bf16.vlgmr.msra.gmra.mxu0 %vm435_vm0, %v672_v19 }
 0x451   : > { %2033 = vmatprep.mubr.msk.bf16.mxu0 %vm2384_vm1, %v2383_v8 }
 0x510   : > { %v722_v20 = vpop.f32.mrf.mxu0 }
 0x511   : > { %v2653_v21 = vpack.c.bf16 %v722_v20, %v722_v20 }
 0x512   : > { %v2029_v22 = vpop.f32.mrf.mxu0 }
 0x513   : > { %735 = vrot.lane.b32.xlu0 %v2653_v21, %s2385_s27  ;;  %s2394_s27 = smov 72  }
 0x514   : > { %v725_v23 = vpop.f32.mrf.mxu0 }
 0x516   : > { %v2030_v24 = vpop.f32.mrf.mxu0 }
 0x517   : > { %849 = vrot.lane.b32.xlu0 %v2653_v21, %s2386_s24  ;;  %s2395_s24 = smov 48  }
 0x585   : > { %v736_v25 = vpop.permute.xlu0 %735 }
 0x586   : > { %v742_v26 = vsel %vm737_vm2, %v736_v25, 0 }
 0x587   : > { %2032 = vmatpush3.bf16.xpose.msra.mxu0 %v742_v26 }
 0x588   : > { %2037 = vmatprep.subr.bf16.mxu0 %v2383_v8 }
 0x589   : > { %v850_v47 = vpop.permute.xlu0 %849 }
 0x58a   : > { %v855_v50 = vsel %vm737_vm2, %v850_v47, 0 }
 0x58e   : > { %2034 = vmatmul.mubr.msk.bf16.vlgmr.msra.gmra.mxu0 %vm737_vm2, %v2653_v21 }
 0x58f   : > { %2039 = vmatprep.mubr.msk.bf16.mxu0 %vm2384_vm1, %v2383_v8 }
 0x64e   : > { %v778_v29 = vpop.f32.mrf.mxu0 }
 0x64f   : > { %v784_v32 = vmul.f32 0.35355338, %v778_v29 }
 0x650   : > { %v2035_v33 = vpop.f32.mrf.mxu0 }
 0x651   : > { %v785_v34 = vadd.f32 %v784_v32, %v2670_v31 }
 0x652   : > { %v781_v35 = vpop.f32.mrf.mxu0 }
 0x653   : > { %v786_v36 = vsel %vm737_vm2, %v785_v34, -inf }
 0x654   : > { %v2036_v37 = vpop.f32.mrf.mxu0  ;;  %787 = vmax.xlane.f32.xlu1 %v786_v36 }
 0x6dd   : > { %v788_v38 = vpop.xlane.xlu1 %787 }
 0x6de   : > { %v789_v39 = vsub.f32 %v785_v34, %v788_v38 }
 0x6e0   : > { %v790_v40 = vmul.f32 1.442695, %v789_v39 }
 0x6e2   : > { %2243 = vpow2.f32 %v790_v40 }
 0x6ef   : > { %v2244_v13 = vpop.eup %2243 }
 0x6f0   : > { %v792_v41 = vsel %vm737_vm2, %v2244_v13, 0.0 }
 0x6f1   : > { %793 = vadd.xlane.f32.xlu1 %v792_v41 }
 0x702   : > { %798 = vrot.lane.b32.xlu1 %v2653_v21, %s2388_s28  ;;  %s2396_s28 = smov 8  }
 0x706   : > { %847 = vrot.lane.b32.xlu1 %v2653_v21, %s2389_s29  ;;  %s2397_s29 = smov 40  }
 0x77a   : > { %v794_v42 = vpop.xlane.xlu1 %793 }
 0x77b   : > { %2245 = vrcp.f32 %v794_v42 }
 0x77e   : > { %v799_v43 = vpop.permute.xlu1 %798 }
 0x77f   : > { %v805_v44 = vsel %vm803_vm4, %v799_v43, 0 }
 0x780   : > { %2038 = vmatpush3.bf16.msra.mxu0 %v805_v44 }
 0x781   : > { %2043 = vmatprep.subr.bf16.mxu0 %v2383_v8 }
 0x782   : > { %v848_v51 = vpop.permute.xlu1 %847 }
 0x788   : > { %v2246_v45 = vpop.eup %2245 }
 0x789   : > { %v796_v46 = vmul.f32 %v2246_v45, %v2244_v13 }
 0x78b   : > { %v797_v48 = vpack.c.bf16 %v796_v46, %v796_v46 }
 0x78d   : > { %2040 = vmatmul.mubr.msk.bf16.vlgmr.msra.gmra.mxu0 %vm737_vm2, %v797_v48 }
 0x78e   : > { %2044 = vmatpush3.bf16.xpose.msra.mxu0 %v855_v50  ;;  %2045 = vmatprep.mubr.msk.bf16.mxu0 %vm2384_vm1, %v2383_v8 }
 0x78f   : > { %2049 = vmatprep.subr.bf16.mxu0 %v2383_v8 }
 0x795   : > { %2046 = vmatmul.mubr.msk.bf16.vlgmr.msra.gmra.mxu0 %vm737_vm2, %v848_v51 }
 0x796   : > { %2051 = vmatprep.mubr.msk.bf16.mxu0 %vm2384_vm1, %v2383_v8 }
 0x84d   : > { %v2687_v52 = vpop.f32.mrf.mxu0 }
 0x84f   : > { %v2041_v53 = vpop.f32.mrf.mxu0 }
 0x851   : > { %v844_v54 = vpop.f32.mrf.mxu0 }
 0x853   : > { %v2042_v55 = vpop.f32.mrf.mxu0 }
 0x855   : > { %v891_v57 = vpop.f32.mrf.mxu0 }
 0x856   : > { %v897_v58 = vmul.f32 0.35355338, %v891_v57 }
 0x857   : > { %v2047_v59 = vpop.f32.mrf.mxu0 }
 0x858   : > { %v898_v60 = vadd.f32 %v897_v58, %v2670_v31 }
 0x859   : > { %v894_v61 = vpop.f32.mrf.mxu0 }
 0x85a   : > { %v899_v62 = vsel %vm737_vm2, %v898_v60, -inf }
 0x85b   : > { %900 = vmax.xlane.f32.xlu0 %v899_v62  ;;  %v2048_v63 = vpop.f32.mrf.mxu0 }
 0x871   : > { %911 = vrot.lane.b32.xlu0 %v2653_v21, %s2390_s17  ;;  %s1937_s17 = sshll.u32 %s2495_s16, 7 }
 0x875   : > { %959 = vrot.lane.b32.xlu0 %v2653_v21, %s2391_s19 }
 0x879   : > { %1071 = vrot.lane.b32.xlu0 %v2653_v21, %s2392_s20 }
 0x8e4   : > { %v901_v1 = vpop.xlane.xlu0 %900 }
 0x8e5   : > { %v902_v0 = vsub.f32 %v898_v60, %v901_v1 }
 0x8e7   : > { %v903_v2 = vmul.f32 1.442695, %v902_v0 }
 0x8e8   : > { %v912_v3 = vpop.permute.xlu0 %911 }
 0x8e9   : > { %2247 = vpow2.f32 %v903_v2  ;;  %v917_v4 = vsel %vm803_vm4, %v912_v3, 0 }
 0x8ea   : > { %2050 = vmatpush3.bf16.msra.mxu0 %v917_v4  ;;  %v2219_v4 = vld [vmem:[%s2941_s7 + $0x8] sm:$0xff]  }
 0x8eb   : > { %2055 = vmatprep.subr.bf16.mxu0 %v2383_v8 }
 0x8ec   : > { %v960_v23 = vpop.permute.xlu0 %959 }
 0x8f0   : > { %v1072_v25 = vpop.permute.xlu0 %1071 }
 0x8f6   : > { %v2248_v7 = vpop.eup %2247 }
 0x8f7   : > { %v905_v9 = vsel %vm737_vm2, %v2248_v7, 0.0 }
 0x8f8   : > { %906 = vadd.xlane.f32.xlu1 %v905_v9 }
 0x909   : > { %961 = vrot.lane.b32.xlu1 %v2653_v21, %s2393_s25 }
 0x90d   : > { %1073 = vrot.lane.b32.xlu1 %v2653_v21, %s2394_s27  ;;  %s2398_s27 = smov 16  }
 0x981   : > { %v907_v10 = vpop.xlane.xlu1 %906 }
 0x982   : > { %2249 = vrcp.f32 %v907_v10 }
 0x985   : > { %v962_v18 = vpop.permute.xlu1 %961 }
 0x986   : > { %v967_v20 = vsel %vm737_vm2, %v962_v18, 0 }
 0x989   : > { %v1074_v22 = vpop.permute.xlu1 %1073 }
 0x98a   : > { %v1079_v24 = vsel %vm737_vm2, %v1074_v22, 0 }
 0x98f   : > { %v2250_v11 = vpop.eup %2249 }
 0x990   : > { %v909_v12 = vmul.f32 %v2250_v11, %v2248_v7  ;;  %v2220_v7 = vld [vmem:[%s2941_s7] sm:$0xff]  }
 0x992   : > { %v910_v19 = vpack.c.bf16 %v909_v12, %v909_v12 }
 0x994   : > { %2052 = vmatmul.mubr.msk.bf16.vlgmr.msra.gmra.mxu0 %vm737_vm2, %v910_v19 }
 0x995   : > { %2056 = vmatpush3.bf16.xpose.msra.mxu0 %v967_v20  ;;  %2057 = vmatprep.mubr.msk.bf16.mxu0 %vm2384_vm1, %v2383_v8 }
 0x996   : > { %2067 = vmatprep.subr.bf16.mxu0 %v2383_v8 }
 0x99c   : > { %2058 = vmatmul.mubr.msk.bf16.vlgmr.msra.gmra.mxu0 %vm737_vm2, %v960_v23 }
 0x99d   : > { %2068 = vmatpush3.bf16.xpose.msra.mxu0 %v1079_v24  ;;  %2069 = vmatprep.mubr.msk.bf16.mxu0 %vm2384_vm1, %v2383_v8 }
 0x99e   : > { %2079 = vmatprep.subr.bf16.mxu0 %v2383_v8 }
 0x9a4   : > { %2070 = vmatmul.mubr.msk.bf16.vlgmr.msra.gmra.mxu0 %vm737_vm2, %v1072_v25 }
 0x9a5   : > { %2083 = vmatprep.mubr.msk.bf16.mxu0 %vm2384_vm1, %v2383_v8  ;;  %2080 = vmatpush3.bf16.msra.mxu0 %v2219_v4 }
 0x9a6   : > { %2081 = vmatprep.subr.bf16.mxu0 %v2383_v8 }
 0x9a9   : > { %2082 = vmatpush3.bf16.msra.mxu0 %v2220_v7 }
 0x9aa   : > { %2095 = vmatprep.subr.bf16.mxu0 %v2383_v8 }
 0xa54   : > { %v953_v26 = vpop.f32.mrf.mxu0 }
 0xa56   : > { %v2053_v27 = vpop.f32.mrf.mxu0 }
 0xa58   : > { %v956_v29 = vpop.f32.mrf.mxu0 }
 0xa5a   : > { %v2054_v30 = vpop.f32.mrf.mxu0 }
 0xa5c   : > { %v1003_v32 = vpop.f32.mrf.mxu0 }
 0xa5d   : > { %v1009_v33 = vmul.f32 0.35355338, %v1003_v32 }
 0xa5e   : > { %v2059_v34 = vpop.f32.mrf.mxu0 }
 0xa5f   : > { %v1010_v35 = vadd.f32 %v1009_v33, %v2670_v31 }
 0xa60   : > { %v1006_v36 = vpop.f32.mrf.mxu0 }
 0xa61   : > { %v1011_v37 = vsel %vm737_vm2, %v1010_v35, -inf }
 0xa62   : > { %1012 = vmax.xlane.f32.xlu1 %v1011_v37  ;;  %v2060_v38 = vpop.f32.mrf.mxu0 }
 0xa64   : > { %v1115_v39 = vpop.f32.mrf.mxu0 }
 0xa65   : > { %v1121_v40 = vmul.f32 0.35355338, %v1115_v39 }
 0xa66   : > { %v2071_v13 = vpop.f32.mrf.mxu0 }
 0xa67   : > { %v1122_v41 = vadd.f32 %v1121_v40, %v2670_v31 }
 0xa68   : > { %v1118_v42 = vpop.f32.mrf.mxu0 }
 0xa69   : > { %v1123_v43 = vsel %vm737_vm2, %v1122_v41, -inf  ;;  %v2223_v42 = vld [vmem:[%s2942_s8] sm:$0xff]  }
 0xa6a   : > { %1124 = vmax.xlane.f32.xlu0 %v1123_v43  ;;  %v2072_v44 = vpop.f32.mrf.mxu0  ;;  %v2224_v43 = vld [vmem:[%s2943_s9] sm:$0xff]  }
 0xa73   : > { %1023 = vrot.lane.b32.xlu1 %v2653_v21, %s2395_s24  ;;  %s2399_s24 = smov 24  }
 0xa77   : > { %1184 = vrot.lane.b32.xlu1 %v953_v26, %s2396_s28  ;;  %s422_s28 = sand.u32 1, %s2371_s14  }
 0xa78   : > { %s1790_s26 = scalar_lea.sflag [#allocation6], %s422_s28 }
 0xaeb   : > { %v1013_v45 = vpop.xlane.xlu1 %1012 }
 0xaec   : > { %v1014_v46 = vsub.f32 %v1010_v35, %v1013_v45 }
 0xaee   : > { %v1015_v47 = vmul.f32 1.442695, %v1014_v46 }
 0xaef   : > { %v1024_v48 = vpop.permute.xlu1 %1023 }
 0xaf0   : > { %2251 = vpow2.f32 %v1015_v47  ;;  %v1029_v50 = vsel %vm803_vm4, %v1024_v48, 0  ;;  %v2767_v47 = vsub.s32 5, %v2566_v14  ;;  %v2770_v48 = vsub.s32 6, %v2566_v14 }
 0xaf1   : > { %2062 = vmatpush3.bf16.msra.mxu1 %v1029_v50 }
 0xaf2   : > { %2073 = vmatprep.subr.bf16.mxu1 %v2383_v8  ;;  %v1282_v50 = vrot.slane %v2574_v16, %v2767_v47 }
 0xaf3   : > { %v1125_v31 = vpop.xlane.xlu0 %1124  ;;  %v1185_v23 = vpop.permute.xlu1 %1184 }
 0xaf4   : > { %v1126_v51 = vsub.f32 %v1122_v41, %v1125_v31  ;;  %v1195_v25 = vsel %vm737_vm2, %v2687_v52, %v1185_v23  ;;  %v2222_v41 = vld [vmem:[%s2943_s9 + $0x8] sm:$0xff]  }
 0xaf6   : > { %v1127_v53 = vmul.f32 1.442695, %v1126_v51 }
 0xaf8   : > { %2253 = vpow2.f32 %v1127_v53  ;;  %v1287_v53 = vrot.slane %v2574_v16, %v2770_v48 }
 0xafd   : > { %v2252_v54 = vpop.eup %2251 }
 0xafe   : > { %v1017_v55 = vsel %vm737_vm2, %v2252_v54, 0.0 }
 0xaff   : > { %1018 = vadd.xlane.f32.xlu0 %v1017_v55  ;;  %v1908_v55 = vsel %vm1263_vm7, 1.0, %v2383_v8 }
 0xb05   : > { %v2254_v57 = vpop.eup %2253 }
 0xb06   : > { %v1129_v58 = vsel %vm737_vm2, %v2254_v57, 0.0 }
 0xb07   : > { %1130 = vadd.xlane.f32.xlu0 %v1129_v58 }
 0xb1d   : > { %1135 = vrot.lane.b32.xlu0 %v2653_v21, %s2397_s29  ;;  %s1880_s29 = sshll.u32 %s422_s28, 3 }
 0xb1e   : > { %s424_s19 = scalar_lea.vmem [#allocation7], %s1880_s29 }
 0xb1f   : > { %s1803_s20 = sshll.u32 %s424_s19, 4  ;;  %s1804_s20 = int_to_ptr.vmem [resolvable:$true] %s1803_s20 }
 0xb20   : > { %s2313_s1 = scalar_lea.vmem %s1804_s20, 128 }
 0xb21   : > { %p2314_p11 = scmp.ne.s32.totalorder %s1804_s20, %s2313_s1 }
 0xb23   : > { %p2315_p0 = pnand %p2314_p11, %p2512_p10 }
 0xb25   : > { %p2316_p1 = pneg %p2315_p0 }
 0xb88   : > { %v1019_v59 = vpop.xlane.xlu0 %1018 }
 0xb89   : > { %2255 = vrcp.f32 %v1019_v59 }
 0xb90   : > { %v1131_v60 = vpop.xlane.xlu0 %1130 }
 0xb91   : > { %2257 = vrcp.f32 %v1131_v60  ;;  %v2226_v60 = vld [vmem:[%s2944_s10] sm:$0xff]  }
 0xb94   : > { %v1136_v63 = vpop.permute.xlu0 %1135 }
 0xb95   : > { %v1141_v0 = vsel %vm803_vm4, %v1136_v63, 0 }
 0xb96   : > { %v2256_v61 = vpop.eup %2255 }
 0xb97   : > { %v1021_v62 = vmul.f32 %v2256_v61, %v2252_v54  ;;  %v2797_v61 = vld [vmem:[%s2956_s2 + $0x8] sm:$0xff] }
 0xb99   : > { %v1022_v1 = vpack.c.bf16 %v1021_v62, %v1021_v62  ;;  %v1361_v62 = vrot.slane %v2797_v61, %v2569_v15 }
 0xb9b   : > { %2064 = vmatmul.mubr.msk.bf16.vlgmr.msra.gmra.mxu1 %vm737_vm2, %v1022_v1 }
 0xb9c   : > { %2074 = vmatpush3.bf16.msra.mxu1 %v1141_v0  ;;  %2075 = vmatprep.mubr.msk.bf16.mxu1 %vm2384_vm1, %v2383_v8 }
 0xb9d   : > { %2087 = vmatprep.subr.bf16.mxu1 %v2383_v8 }
 0xb9e   : > { %v2258_v2 = vpop.eup %2257 }
 0xb9f   : > { %v1133_v21 = vmul.f32 %v2258_v2, %v2254_v57 }
 0xba1   : > { %v1134_v3 = vpack.c.bf16 %v1133_v21, %v1133_v21 }
 0xba3   : > { %2076 = vmatmul.mubr.msk.bf16.vlgmr.msra.gmra.mxu1 %vm737_vm2, %v1134_v3 }
 0xba4   : > { %2091 = vmatprep.mubr.msk.bf16.mxu1 %vm2384_vm1, %v2383_v8 }
 0xc5b   : > { %v1065_v9 = vpop.f32.mrf.mxu1 }
 0xc5c   : > { %1188 = vrot.lane.b32.xlu1 %v1065_v9, %s2398_s27 }
 0xc5d   : > { %v2065_v10 = vpop.f32.mrf.mxu1 }
 0xc5f   : > { %v1068_v11 = vpop.f32.mrf.mxu1 }
 0xc61   : > { %v2066_v12 = vpop.f32.mrf.mxu1 }
 0xc63   : > { %v1177_v18 = vpop.f32.mrf.mxu1 }
 0xc64   : > { %1192 = vrot.lane.b32.xlu1 %v1177_v18, %s2399_s24  ;;  %v1297_v18 = vsub.s32 7, %v2566_v14  ;;  %s1801_s24 = scalar_lea.hbm %s2947_s13, %s1937_s17 }
 0xc65   : > { %v2077_v19 = vpop.f32.mrf.mxu1 }
 0xc66   : > { %v1298_v19 = vrot.slane %v2574_v16, %v1297_v18 }
 0xc67   : > { %v1180_v20 = vpop.f32.mrf.mxu1 }
 0xc68   : > { %v2808_v20 = vld [vmem:[%s2956_s2 + $0x10] sm:$0xff]  ;;  %s2400_s2 = smov [#allocation7]  }
 0xc69   : > { %v2078_v22 = vpop.f32.mrf.mxu1  ;;  %v1424_v16 = vrot.slane %v2808_v20, %v2644_v6  ;;  %s2317_s3 = sshll.u32 %s2400_s2, 4  ;;  %s2318_s3 = int_to_ptr.vmem [resolvable:$false] %s2317_s3 }
 0xc6a   : > { %s2319_s16 = scalar_lea.vmem %s2318_s3, 256  ;;  %p2320_p2 = scmp.lt.s32.totalorder %s1804_s20, %s2318_s3 }
 0xc6b   : > { %p2321_p3 = scmp.lt.s32.totalorder %s2319_s16, %s2313_s1 }
 0xc6d   : > { %p2322_p4 = por %p2321_p3, %p2320_p2 }
 0xc6f   : > { %p2323_p5 = pnand %p2322_p4, %p2316_p1 }
 0xcce   : > { %v1189_v24 = vpop.permute.xlu1 %1188 }
 0xccf   : > { %v1197_v26 = vsel %vm1196_vm5, %v1195_v25, %v1189_v24  ;;  %v1434_v25 = vrot.slane %v2808_v20, %v2621_v49 }
 0xcd6   : > { %v1193_v27 = vpop.permute.xlu1 %1192 }
 0xcd7   : > { %v1199_v29 = vsel %vm1198_vm6, %v1197_v26, %v1193_v27  ;;  %v1916_v26 = vsel %vm1427_vm8, 1.0, %v2383_v8  ;;  %v1917_v27 = vsel %vm1438_vm9, 1.0, %v2383_v8 }
 0xcd8   : > { %v1204_v30 = vpack.c.bf16 %v1199_v29, %v1199_v29 }
 0xcda   : > { %2084 = vmatmul.mubr.msk.bf16.vlgmr.msra.gmra.mxu0 %vm435_vm0, %v1204_v30 }
 0xcdb   : > { %2099 = vmatprep.mubr.msk.bf16.mxu0 %vm2384_vm1, %v2383_v8  ;;  %2096 = vmatpush3.bf16.msra.mxu0 %v2222_v41 }
 0xcdc   : > { %2097 = vmatprep.subr.bf16.mxu0 %v2383_v8 }
 0xcdf   : > { %2098 = vmatpush3.bf16.msra.mxu0 %v2224_v43 }
 0xce0   : > { %2111 = vmatprep.subr.bf16.mxu0 %v2383_v8 }
 0xd9a   : > { %v1254_v32 = vpop.f32.mrf.mxu0 }
 0xd9b   : > { %v2744_v33 = vadd.f32 %v1254_v32, %v2626_v56  ;;  %v2221_v56 = vld [vmem:[%s2942_s8 + $0x8] sm:$0xff]  }
 0xd9c   : > { %v2085_v34 = vpop.f32.mrf.mxu0  ;;  %2088 = vmatpush3.bf16.msra.mxu1 %v2221_v56  ;;  %v1456_v56 = vrot.slane %v2808_v20, %v2767_v47 }
 0xd9d   : > { %v1266_v35 = vsel %vm435_vm0, %v2744_v33, 0.0  ;;  %2089 = vmatprep.subr.bf16.mxu1 %v2383_v8  ;;  %v1918_v34 = vsel %vm1449_vm10, 1.0, %v2383_v8 }
 0xd9e   : > { %1267 = vadd.xlane.f32.xlu0 %v1266_v35  ;;  %v1257_v36 = vpop.f32.mrf.mxu0  ;;  %v1445_v35 = vrot.slane %v2808_v20, %v2641_v5 }
 0xda0   : > { %v2086_v52 = vpop.f32.mrf.mxu0  ;;  %2090 = vmatpush3.bf16.msra.mxu1 %v2223_v42 }
 0xda1   : > { %2103 = vmatprep.subr.bf16.mxu1 %v2383_v8 }
 0xe27   : > { %v1268_v37 = vpop.xlane.xlu0 %1267 }
 0xe28   : > { %v1269_v38 = vmul.f32 0.03125, %v1268_v37 }
 0xe2a   : > { %v1270_v39 = vsub.f32 %v2744_v33, %v1269_v38  ;;  %v1919_v38 = vsel %vm1460_vm11, 1.0, %v2383_v8 }
 0xe2c   : > { %v1271_v40 = vmul.f32 %v1270_v39, %v1270_v39 }
 0xe2e   : > { %v1272_v13 = vsel %vm435_vm0, %v1271_v40, 0.0 }
 0xe2f   : > { %1273 = vadd.xlane.f32.xlu1 %v1272_v13 }
 0xeb8   : > { %v1274_v44 = vpop.xlane.xlu1 %1273 }
 0xeb9   : > { %v1275_v45 = vmul.f32 0.03125, %v1274_v44  ;;  %v1467_v44 = vrot.slane %v2808_v20, %v2770_v48 }
 0xebb   : > { %v1276_v46 = vadd.f32 1e-05, %v1275_v45 }
 0xebd   : > { %2259 = vrsqrt.f32 %v1276_v46 }
 0xeca   : > { %v2260_v31 = vpop.eup %2259 }
 0xecb   : > { %v1278_v51 = vmul.f32 %v2260_v31, %v1270_v39 }
 0xecd   : > { %v1283_v54 = vmul.f32 %v1282_v50, %v1278_v51  ;;  %v1473_v51 = vrot.slane %v2797_v61, %v2577_v17 }
 0xecf   : > { %v1288_v57 = vadd.f32 %v1287_v53, %v1283_v54  ;;  %v1478_v53 = vrot.slane %v2797_v61, %v2621_v49  ;;  %v1500_v49 = vrot.slane %v2797_v61, %v2644_v6  ;;  %v2227_v6 = vld [vmem:[%s2945_s11 + $0x8] sm:$0xff]  }
 0xed1   : > { %v1289_v58 = vmul.f32 %v1908_v55, %v1288_v57  ;;  %v1483_v57 = vrot.slane %v2797_v61, %v2641_v5 }
 0xed3   : > { %v1294_v59 = vpack.c.bf16 %v1289_v58, %v1289_v58 }
 0xed5   : > { %2092 = vmatmul.mubr.msk.bf16.vlgmr.msra.gmra.mxu1 %vm435_vm0, %v1294_v59  ;;  %2100 = vmatmul.mubr.msk.bf16.vlgmr.msra.gmra.mxu0 %vm435_vm0, %v1294_v59 }
 0xed6   : > { %2107 = vmatprep.mubr.msk.bf16.mxu1 %vm2384_vm1, %v2383_v8  ;;  %2115 = vmatprep.mubr.msk.bf16.mxu0 %vm2384_vm1, %v2383_v8 }
 0xed7   : > { %2104 = vmatpush3.bf16.msra.mxu1 %v2225_v28  ;;  %2112 = vmatpush3.bf16.msra.mxu0 %v2227_v6 }
 0xed8   : > { %2105 = vmatprep.subr.bf16.mxu1 %v2383_v8  ;;  %2113 = vmatprep.subr.bf16.mxu0 %v2383_v8 }
 0xedb   : > { %2106 = vmatpush3.bf16.msra.mxu1 %v2226_v60 }
 0xedc   : > { %2119 = vmatprep.subr.bf16.mxu1 %v2383_v8 }
 0xf95   : > { %v1348_v63 = vpop.f32.mrf.mxu1  ;;  %v1408_v1 = vpop.f32.mrf.mxu0 }
 0xf96   : > { %v1409_v0 = vadd.f32 %v1408_v1, %v1361_v62  ;;  %v1349_v22 = vadd.f32 %v1348_v63, %v1298_v19 }
 0xf97   : > { %v2093_v2 = vpop.f32.mrf.mxu1  ;;  %v2101_v21 = vpop.f32.mrf.mxu0 }
 0xf98   : > { %v1915_v3 = vmul.f32 -1.442695, %v1409_v0 }
 0xf99   : > { %v1351_v4 = vpop.f32.mrf.mxu1  ;;  %v1411_v7 = vpop.f32.mrf.mxu0 }
 0xf9a   : > { %2261 = vpow2.f32 %v1915_v3 }
 0xf9b   : > { %v2094_v9 = vpop.f32.mrf.mxu1  ;;  %v2102_v10 = vpop.f32.mrf.mxu0 }
 0xfa7   : > { %v2262_v11 = vpop.eup %2261 }
 0xfa8   : > { %v1417_v12 = vadd.f32 1.0, %v2262_v11 }
 0xfaa   : > { %2263 = vrcp.f32 %v1417_v12 }
 0xfb7   : > { %v2264_v23 = vpop.eup %2263 }
 0xfb8   : > { %v1420_v24 = vmul.f32 %v2264_v23, %v1349_v22 }
 0xfba   : > { %v1426_v29 = vrot.slane %v1420_v24, 6  ;;  %v1437_v30 = vrot.slane %v1420_v24, 7  ;;  %v1448_v32 = vrot.slane %v1420_v24, 1  ;;  %v1459_v37 = vrot.slane %v1420_v24, 2 }
 0xfbb   : > { %v1425_v39 = vmul.f32 %v1424_v16, %v1420_v24  ;;  %v1573_v16 = vrot.slane %v2797_v61, %v2767_v47  ;;  %v2230_v47 = vld [vmem:[%s2946_s12 + $0x30] sm:$0xff]  }
 0xfbc   : > { %v1430_v36 = vmul.f32 %v1916_v26, %v1426_v29  ;;  %v1441_v52 = vmul.f32 %v1917_v27, %v1437_v30  ;;  %v1452_v13 = vmul.f32 %v1918_v34, %v1448_v32  ;;  %v1463_v43 = vmul.f32 %v1919_v38, %v1459_v37  ;;  %v2234_v37 = vld [vmem:[%s2946_s12 + $0x10] sm:$0xff]   ;;  %v2235_v38 = vld [vmem:[%s2946_s12 + $0x8] sm:$0xff]  }
 0xfbd   : > { %v1578_v29 = vrot.slane %v2797_v61, %v2770_v48  ;;  %v2231_v48 = vld [vmem:[%s2946_s12 + $0x28] sm:$0xff]  }
 0xfbe   : > { %v1435_v40 = vmul.f32 %v1434_v25, %v1430_v36  ;;  %v1446_v42 = vmul.f32 %v1445_v35, %v1441_v52  ;;  %v1457_v46 = vmul.f32 %v1456_v56, %v1452_v13  ;;  %v1468_v31 = vmul.f32 %v1467_v44, %v1463_v43  ;;  %v2229_v35 = vld [vmem:[%s2946_s12 + $0x38] sm:$0xff]   ;;  %v2232_v36 = vld [vmem:[%s2946_s12 + $0x20] sm:$0xff]  }
 0xfbf   : > { %v2233_v52 = vld [vmem:[%s2946_s12 + $0x18] sm:$0xff]  }
 0xfc0   : > { %v1436_v41 = vadd.f32 %v1435_v40, %v1425_v39  ;;  %v2236_v39 = vld [vmem:[%s2946_s12] sm:$0xff]  }
 0xfc1   : > { %v1924_v40 = vld [vmem:[#allocation4 + $0x1] ss:$0 sm:$0xff] }
 0xfc2   : > { %v1447_v45 = vadd.f32 %v1446_v42, %v1436_v41 }
 0xfc4   : > { %v1458_v50 = vadd.f32 %v1457_v46, %v1447_v45 }
 0xfc6   : > { %v1469_v54 = vadd.f32 %v1468_v31, %v1458_v50 }
 0xfc8   : > { %v1474_v55 = vadd.f32 %v1473_v51, %v1469_v54 }
 0xfca   : > { %v1479_v58 = vmul.f32 %v1478_v53, %v1474_v55 }
 0xfcc   : > { %v1484_v59 = vadd.f32 %v1483_v57, %v1479_v58 }
 0xfce   : > { %v1920_v28 = vmul.f32 -1.442695, %v1484_v59 }
 0xfd0   : > { %2265 = vpow2.f32 %v1920_v28 }
 0xfdd   : > { %v2266_v60 = vpop.eup %2265 }
 0xfde   : > { %v1488_v62 = vadd.f32 1.0, %v2266_v60 }
 0xfe0   : > { %2267 = vrcp.f32 %v1488_v62 }
 0xfed   : > { %v2268_v63 = vpop.eup %2267 }
 0xfee   : > { %v1491_v1 = vmul.f32 %v2268_v63, %v1484_v59 }
 0xff0   : > { %v1496_v0 = vpack.c.bf16 %v1491_v1, %v1491_v1 }
 0xff2   : > { %2108 = vmatmul.mubr.msk.bf16.vlgmr.msra.gmra.mxu1 %vm435_vm0, %v1496_v0 }
 0xff3   : > { %2135 = vmatprep.mubr.msk.bf16.mxu1 %vm2384_vm1, %v2383_v8  ;;  %2120 = vmatpush3.bf16.msra.mxu1 %v2229_v35 }
 0xff4   : > { %2121 = vmatprep.subr.bf16.mxu1 %v2383_v8 }
 0xff7   : > { %2122 = vmatpush3.bf16.msra.mxu1 %v2230_v47 }
 0xff8   : > { %2123 = vmatprep.subr.bf16.mxu1 %v2383_v8 }
 0xffb   : > { %2124 = vmatpush3.bf16.msra.mxu1 %v2231_v48 }
 0xffc   : > { %2125 = vmatprep.subr.bf16.mxu1 %v2383_v8 }
 0xfff   : > { %2126 = vmatpush3.bf16.msra.mxu1 %v2232_v36 }
0x1000   : > { %2127 = vmatprep.subr.bf16.mxu1 %v2383_v8 }
0x1003   : > { %2128 = vmatpush3.bf16.msra.mxu1 %v2233_v52 }
0x1004   : > { %2129 = vmatprep.subr.bf16.mxu1 %v2383_v8 }
0x1007   : > { %2130 = vmatpush3.bf16.msra.mxu1 %v2234_v37 }
0x1008   : > { %2131 = vmatprep.subr.bf16.mxu1 %v2383_v8 }
0x100b   : > { %2132 = vmatpush3.bf16.msra.mxu1 %v2235_v38 }
0x100c   : > { %2133 = vmatprep.subr.bf16.mxu1 %v2383_v8  ;;  %v1674_v8 = vrot.slane %v2797_v61, %v1297_v18 }
0x100f   : > { %2134 = vmatpush3.bf16.msra.mxu1 %v2236_v39 }
0x10b2   : > { %v1550_v2 = vpop.f32.mrf.mxu1 }
0x10b3   : > { %v1551_v5 = vadd.f32 %v1550_v2, %v1500_v49 }
0x10b4   : > { %v2109_v21 = vpop.f32.mrf.mxu1 }
0x10b5   : > { %v2840_v3 = vadd.f32 %v1551_v5, %v2744_v33  ;;  %v2228_v33 = vld [vmem:[%s2945_s11] sm:$0xff]  }
0x10b6   : > { %v1553_v4 = vpop.f32.mrf.mxu1  ;;  %2114 = vmatpush3.bf16.msra.mxu0 %v2228_v33 }
0x10b7   : > { %v1557_v7 = vsel %vm435_vm0, %v2840_v3, 0.0 }
0x10b8   : > { %1558 = vadd.xlane.f32.xlu0 %v1557_v7  ;;  %v2110_v9 = vpop.f32.mrf.mxu1 }
0x1141   : > { %v1559_v10 = vpop.xlane.xlu0 %1558 }
0x1142   : > { %v1560_v11 = vmul.f32 0.03125, %v1559_v10  ;;  %v1786_v10 = vrot.slane %v2808_v20, %v2577_v17 }
0x1144   : > { %v1561_v12 = vsub.f32 %v2840_v3, %v1560_v11 }
0x1146   : > { %v1562_v19 = vmul.f32 %v1561_v12, %v1561_v12 }
0x1148   : > { %v1563_v22 = vsel %vm435_vm0, %v1562_v19, 0.0 }
0x1149   : > { %1564 = vadd.xlane.f32.xlu0 %v1563_v22 }
0x11d2   : > { %v1565_v23 = vpop.xlane.xlu0 %1564 }
0x11d3   : > { %v1566_v24 = vmul.f32 0.03125, %v1565_v23 }
0x11d5   : > { %v1567_v25 = vadd.f32 1e-05, %v1566_v24 }
0x11d7   : > { %2269 = vrsqrt.f32 %v1567_v25 }
0x11e4   : > { %v2270_v26 = vpop.eup %2269 }
0x11e5   : > { %v1569_v27 = vmul.f32 %v2270_v26, %v1561_v12 }
0x11e7   : > { %v1574_v30 = vmul.f32 %v1573_v16, %v1569_v27 }
0x11e9   : > { %v1579_v32 = vadd.f32 %v1578_v29, %v1574_v30 }
0x11eb   : > { %v1584_v34 = vpack.c.bf16 %v1579_v32, %v1579_v32 }
0x11ed   : > { %2116 = vmatmul.mubr.msk.bf16.vlgmr.msra.gmra.mxu0 %vm435_vm0, %v1584_v34 }
0x12ad   : > { %v1639_v13 = vpop.f32.mrf.mxu0 }
0x12ae   : > { %v1640_v56 = vadd.f32 %v1924_v40, %v1639_v13 }
0x12af   : > { %v2117_v41 = vpop.f32.mrf.mxu0 }
0x12b0   : > { %v1646_v42 = vmul.f32 0.044715, %v1640_v56  ;;  %v1645_v53 = vmul.f32 0.5, %v1640_v56 }
0x12b1   : > { %v1642_v43 = vpop.f32.mrf.mxu0 }
0x12b2   : > { %v1647_v44 = vmul.f32 %v1646_v42, %v1640_v56 }
0x12b3   : > { %v2118_v45 = vpop.f32.mrf.mxu0 }
0x12b4   : > { %v1648_v46 = vmul.f32 %v1647_v44, %v1640_v56 }
0x12b6   : > { %v1649_v50 = vadd.f32 %v1648_v46, %v1640_v56 }
0x12b8   : > { %v1650_v31 = vmul.f32 0.7978846, %v1649_v50 }
0x12ba   : > { %2271 = vtanh.f32 %v1650_v31 }
0x12c7   : > { %v2272_v51 = vpop.eup %2271 }
0x12c8   : > { %v1652_v54 = vadd.f32 1.0, %v2272_v51 }
0x12ca   : > { %v1653_v55 = vmul.f32 %v1652_v54, %v1645_v53 }
0x12cc   : > { %v1670_v57 = vpack.c.bf16 %v1653_v55, %v1653_v55 }
0x12ce   : > { %2136 = vmatmul.mubr.bf16.vlgmr.msra.gmra.mxu1 %v1670_v57 }
0x138e   : > { %v1757_v58 = vpop.f32.mrf.mxu1 }
0x138f   : > { %v1758_v59 = vadd.f32 %v1757_v58, %v1674_v8 }
0x1390   : > { %v2137_v28 = vpop.f32.mrf.mxu1 }
0x1391   : > { %v1763_v60 = vmul.f32 0.5, %v1758_v59 }
0x1392   : > { %v1760_v62 = vpop.f32.mrf.mxu1 }
0x1393   : > { %v1764_v63 = vadd.f32 %v1763_v60, %v2840_v3  ;;  %v1781_v3 = vrot.slane %v2808_v20, %v2569_v15 }
0x1394   : > { %v2138_v1 = vpop.f32.mrf.mxu1 }
0x1395   : > { %v1765_v0 = vsel %vm435_vm0, %v1764_v63, 0.0 }
0x1396   : > { %1766 = vadd.xlane.f32.xlu0 %v1765_v0 }
0x141f   : > { %v1767_v49 = vpop.xlane.xlu0 %1766 }
0x1420   : > { %v1768_v2 = vmul.f32 0.03125, %v1767_v49 }
0x1422   : > { %v1769_v5 = vsub.f32 %v1764_v63, %v1768_v2 }
0x1424   : > { %v1770_v21 = vmul.f32 %v1769_v5, %v1769_v5 }
0x1426   : > { %v1771_v14 = vsel %vm435_vm0, %v1770_v21, 0.0 }
0x1427   : > { %1772 = vadd.xlane.f32.xlu1 %v1771_v14 }
0x14b0   : > { %v1773_v61 = vpop.xlane.xlu1 %1772 }
0x14b1   : > { %v1774_v18 = vmul.f32 0.03125, %v1773_v61 }
0x14b3   : > { %v1775_v4 = vadd.f32 1e-05, %v1774_v18 }
0x14b5   : > { %2273 = vrsqrt.f32 %v1775_v4 }
0x14c2   : > { %v2274_v7 = vpop.eup %2273 }
0x14c3   : > { %v1777_v9 = vmul.f32 %v2274_v7, %v1769_v5 }
0x14c5   : > { %v1782_v11 = vmul.f32 %v1781_v3, %v1777_v9 }
0x14c7   : > { %v1787_v12 = vadd.f32 %v1786_v10, %v1782_v11 }
0x14c9   : > { %1788 = vst.msk [vmem:[%s424_s19] sm:$0xff] %vm435_vm0, %v1787_v12 }
0x14ca   : > { %2326 = shalt.err (!%p2323_p5)
}
0x14cb   : > { %s2327_s29 = scalar_lea.hbm %s1801_s24, 128  ;;  %s2331_s19 = scalar_lea.hbm %s2947_s13, 256 }
0x14cc   : > { %p2328_p6 = scmp.ne.s32.totalorder %s1801_s24, %s2327_s29  ;;  %p2332_p9 = scmp.lt.s32.totalorder %s1801_s24, %s2947_s13 }
0x14cd   : > { %p2333_p12 = scmp.lt.s32.totalorder %s2331_s19, %s2327_s29 }
0x14ce   : > { %p2329_p7 = pnand %p2328_p6, %p2512_p10 }
0x14cf   : > { %p2334_p13 = por %p2333_p12, %p2332_p9 }
0x14d0   : > { %p2330_p8 = pneg %p2329_p7 }
0x14d2   : > { %p2335_p11 = pnand %p2334_p13, %p2330_p8 }
0x14d4   : > { %2338 = shalt.err (!%p2335_p11)
}
0x14d5   : > { %2143 = dma.vmem_to_hbm [thread:$0]  (%p2512_p10), %s1804_s20, 128, %s1801_s24, %s1790_s26  }
0x14d6 PF: > { %p2155_p0 = scmp.ge.s32.totalorder %s2379_s15, 2  ;;  %s1815_s1 = sand.u32 1, %s2367_s30  }
0x14d7   : > { %p2957_p1 = scmp.ne.s32.totalorder %s2952_s23, 0  ;;  %s1816_s2 = scalar_lea.sflag [#allocation6], %s1815_s1 }
0x14d9   : > { %p2150_p2 = pnand %p2155_p0, %p2957_p1 }
0x14db   : > { %p2151_p3 = pneg %p2150_p2 }
0x14dd   : > { %2362 = dma.done.wait (%p2151_p3), %s1816_s2, 128  }
0x14de   : > { %2364 = vsyncadd (%p2151_p3), %s1816_s2, 4294967168  ;;  %p30_p4 = scmp.ge.s32.totalorder %s2499_s18, 4   ;;  %s2958_s30 = smov %s2371_s14 }
0x14df   : > { %s2959_s14 = smov %s2375_s0  ;;  %s2960_s0 = smov %s2510_s21 }
0x14e0   : > { %s2961_s15 = smov %s2499_s18  ;;  %32 = sbr.rel (!%p30_p4) target bundleno = 20 (0x14), region = 108 }
0x14e5   :  { %1821 = vsyncpa [#allocation5], 1 }
0x14e6   :  { %1823 = vsyncpa [#allocation5 + $0x1], 1 }
0x14e7   :  { %1824 = vsyncpa [#allocation6], 1 }
0x14e8   :  { %1826 = vsyncpa [#allocation6 + $0x1], 1 }

</bundles_post_ra>
